<compile_context>
chip_gen: v6e
topology: v6e:2x2x1
jax: 0.10.0
libtpu: 0.0.40
codegen_flags: <defaults>
</compile_context>

<pallas_src>
import functools
import math

import jax
import jax.numpy as jnp
from jax import lax
from jax.experimental import pallas as pl
from jax.experimental.pallas import tpu as pltpu


# --------------------------------------------------------------------------
# Kernel: one grid step == one direction x one block of TT time steps.
# --------------------------------------------------------------------------
def _pblstm_kernel(lens_ref, x_ref, wih_ref, b_ref, whh_ref, out_ref,
                   h_scr, c_scr, g_scr, *, TT, Bp, Hp, nTB, unroll):
    d = pl.program_id(0)       # 0 = forward, 1 = backward
    tb = pl.program_id(1)      # time-block index (processing order)

    # reset recurrent state at the start of each direction's sweep
    @pl.when(tb == 0)
    def _():
        h_scr[...] = jnp.zeros_like(h_scr)
        c_scr[...] = jnp.zeros_like(c_scr)

    # ---- fused input projection: one block-wide GEMM, off the recurrent path.
    # g_scr[t*Bp + b, :] = x_t[b] @ W_ih + (b_ih + b_hh)
    g_scr[...] = (jnp.dot(x_ref[...], wih_ref[...],
                          preferred_element_type=jnp.float32)
                  + b_ref[...])

    lens = lens_ref[...]                       # (Bp, 1) int32, resident
    tb_eff = tb + d * (nTB - 1 - 2 * tb)       # fwd: tb, bwd: nTB-1-tb
    t_base = tb_eff * TT

    def step(i, carry):
        h, c = carry
        # row inside the block: fwd walks 0..TT-1, bwd walks TT-1..0
        row = jnp.where(d == 0, i, TT - 1 - i)
        base = pl.multiple_of(row * Bp, 8)
        gates = g_scr[pl.ds(base, Bp), :] + jnp.dot(
            h, whh_ref[...], preferred_element_type=jnp.float32)
        i_g = jax.nn.sigmoid(gates[:, 0 * Hp:1 * Hp])
        f_g = jax.nn.sigmoid(gates[:, 1 * Hp:2 * Hp])
        g_g = jnp.tanh(gates[:, 2 * Hp:3 * Hp])
        o_g = jax.nn.sigmoid(gates[:, 3 * Hp:4 * Hp])
        c_new = f_g * c + i_g * g_g
        h_new = o_g * jnp.tanh(c_new)

        # packed-sequence masking: only update state / emit output for t < length
        mask = (t_base + row) < lens           # (Bp, 1), broadcasts over Hp
        out_ref[row] = jnp.where(mask, h_new, jnp.zeros_like(h_new))
        return jnp.where(mask, h_new, h), jnp.where(mask, c_new, c)

    h_fin, c_fin = lax.fori_loop(0, TT, step, (h_scr[...], c_scr[...]),
                                 unroll=unroll)
    h_scr[...] = h_fin
    c_scr[...] = c_fin


# --------------------------------------------------------------------------
# Helpers
# --------------------------------------------------------------------------
def _round_up(x, m):
    return ((x + m - 1) // m) * m


def _pad_gates_last(w, H, Hp):
    """(..., 4H) -> (..., 4Hp): place each PyTorch gate slice (i,f,g,o) at k*Hp."""
    if Hp == H:
        return w
    pads = [(0, 0)] * (w.ndim - 1)
    parts = [jnp.pad(w[..., k * H:(k + 1) * H], pads + [(0, Hp - H)])
             for k in range(4)]
    return jnp.concatenate(parts, axis=-1)


def _vmem_capacity_bytes():
    try:
        info = pltpu.get_tpu_info()
        for name in ("vmem_capacity_bytes", "vmem_size_bytes", "vmem_bytes"):
            v = getattr(info, name, None)
            if v:
                return int(v)
    except Exception:
        pass
    return 64 * 1024 * 1024   # conservative default (v7x per-TC VMEM)


def _pick_time_block(T2, Bp, INp, Hp, vmem_bytes):
    """Largest TT (multiple of 8 when possible) whose per-grid-step VMEM
    footprint (double-buffered streamed blocks + scratch) fits ~45% of VMEM."""
    fixed = 4 * (2 * (INp * 4 * Hp + 4 * Hp + Hp * 4 * Hp)   # W_ih, bias, W_hh (x2 bufs)
                 + 2 * Bp * Hp                               # h / c scratch
                 + Bp)                                       # lengths
    per_t = 4 * Bp * (2 * INp + 2 * Hp + 4 * Hp)  # x in (x2), out (x2), gate scratch
    budget = int(0.45 * vmem_bytes) - fixed
    tt = budget // per_t if per_t > 0 else T2
    tt = int(max(1, min(tt, T2, 512)))
    if tt >= 8:
        tt = (tt // 8) * 8
    return tt


# --------------------------------------------------------------------------
# Wrapper
# --------------------------------------------------------------------------
def pblstm_forward(x, lx, params, *, time_block=None):
    """x: [B, T, D] float32 (padded), lx: [B] int32.
    Returns (out, lx2): out [B, T//2, 2*H] (zeros past lx2[b]) and lx2 = lx // 2."""
    B, T, D = x.shape
    T_even = (T // 2) * 2
    T2 = T_even // 2
    IN = 2 * D
    H = params['whh_f'].shape[0]
    lx2 = (lx // 2).astype(jnp.int32)

    if T2 == 0:   # guard: nothing to process after time halving
        return jnp.zeros((B, 0, 2 * H), jnp.float32), lx2

    # lane/sublane-friendly padded sizes (padding is mathematically inert)
    Hp = _round_up(H, 128)
    Bp = _round_up(B, 8)
    INp = _round_up(IN, 128)

    vmem_cap = _vmem_capacity_bytes()
    if time_block is None:
        TT = _pick_time_block(T2, Bp, INp, Hp, vmem_cap)
    else:
        TT = max(1, min(int(time_block), T2))
    T2p = _round_up(T2, TT)
    nTB = T2p // TT
    unroll = True if TT <= 8 else 8

    # step 1-2 of pBLSTM: truncate to even T, halve time, double features
    x_r = x[:, :T_even, :].reshape(B, T2, IN)
    x_p = jnp.pad(x_r, ((0, Bp - B), (0, 0), (0, INp - IN)))    # (Bp, T2, INp)
    x_tm = jnp.transpose(x_p, (1, 0, 2))                        # (T2, Bp, INp)
    x_tm = jnp.pad(x_tm, ((0, T2p - T2), (0, 0), (0, 0)))       # (T2p, Bp, INp)
    x_flat = x_tm.reshape(T2p * Bp, INp)

    # stacked, gate-padded weights (dir 0 = forward, 1 = backward)
    def prep(dname):
        wih = _pad_gates_last(params['wih_' + dname], H, Hp)    # (IN, 4Hp)
        wih = jnp.pad(wih, ((0, INp - IN), (0, 0)))             # (INp, 4Hp)
        whh = _pad_gates_last(params['whh_' + dname], H, Hp)    # (H, 4Hp)
        whh = jnp.pad(whh, ((0, Hp - H), (0, 0)))               # (Hp, 4Hp)
        b = _pad_gates_last(params['b_' + dname], H, Hp)        # (1, 4Hp)
        return wih, whh, b

    wih_f, whh_f, b_f = prep('f')
    wih_b, whh_b, b_b = prep('b')
    wih_stack = jnp.stack([wih_f, wih_b])                       # (2, INp, 4Hp)
    whh_stack = jnp.stack([whh_f, whh_b])                       # (2, Hp, 4Hp)
    b_stack = jnp.stack([b_f, b_b])                             # (2, 1, 4Hp)

    lens_p = jnp.pad(lx2, (0, Bp - B)).reshape(Bp, 1)

    kernel = functools.partial(_pblstm_kernel, TT=TT, Bp=Bp, Hp=Hp, nTB=nTB,
                               unroll=unroll)

    def tb_eff(d, tb):
        # forward walks time blocks front-to-back, backward back-to-front
        return tb + d * (nTB - 1 - 2 * tb)

    vmem_limit = max(32 * 1024 * 1024,
                     int(min(0.7 * vmem_cap, 112 * 1024 * 1024)))

    out_pad = pl.pallas_call(
        kernel,
        out_shape=jax.ShapeDtypeStruct((T2p, Bp, 2 * Hp), jnp.float32),
        grid_spec=pltpu.PrefetchScalarGridSpec(
            num_scalar_prefetch=0,
            grid=(2, nTB),
            in_specs=[
                pl.BlockSpec((Bp, 1), lambda d, tb: (0, 0)),                    # lengths
                pl.BlockSpec((TT * Bp, INp), lambda d, tb: (tb_eff(d, tb), 0)), # x block
                pl.BlockSpec((None, INp, 4 * Hp), lambda d, tb: (d, 0, 0)),     # W_ih
                pl.BlockSpec((None, 1, 4 * Hp), lambda d, tb: (d, 0, 0)),       # bias
                pl.BlockSpec((None, Hp, 4 * Hp), lambda d, tb: (d, 0, 0)),      # W_hh
            ],
            out_specs=pl.BlockSpec((TT, Bp, Hp),
                                   lambda d, tb: (tb_eff(d, tb), 0, d)),
            scratch_shapes=[
                pltpu.VMEM((Bp, Hp), jnp.float32),            # h state
                pltpu.VMEM((Bp, Hp), jnp.float32),            # c state
                pltpu.VMEM((TT * Bp, 4 * Hp), jnp.float32),   # gate pre-activations
            ],
        ),
        compiler_params=pltpu.CompilerParams(
            # direction axis is independent (v7x runs it on its 2 TensorCores);
            # time axis carries the recurrence.
            dimension_semantics=("parallel", "arbitrary"),
            vmem_limit_bytes=vmem_limit,
        ),
    )(lens_p, x_flat, wih_stack, b_stack, whh_stack)

    # lanes [0:Hp) hold the forward direction, [Hp:2Hp) the backward direction
    if Hp == H:
        merged = out_pad[:T2, :B, :]
    else:
        merged = jnp.concatenate([out_pad[:T2, :B, :H],
                                  out_pad[:T2, :B, Hp:Hp + H]], axis=-1)
    out = jnp.transpose(merged, (1, 0, 2))      # [B, T2, 2H] batch-major
    return out, lx2


def init_params(key, input_size, H):
    """nn.LSTM-shaped init per direction: weight_ih (4H,in), weight_hh (4H,H),
    bias_ih/bias_hh (4H,).  Stored pre-transposed as (in,4H)/(H,4H) + fused bias."""
    bound = 1.0 / math.sqrt(H)
    keys = jax.random.split(key, 8)

    def u(k, shape):
        return jax.random.uniform(k, shape, jnp.float32, -bound, bound)

    p = {}
    for d, off in (('f', 0), ('b', 4)):
        w_ih = u(keys[off + 0], (4 * H, input_size))
        w_hh = u(keys[off + 1], (4 * H, H))
        b_ih = u(keys[off + 2], (4 * H,))
        b_hh = u(keys[off + 3], (4 * H,))
        p['wih_' + d] = w_ih.T                      # (input_size, 4H)
        p['whh_' + d] = w_hh.T                      # (H, 4H)
        p['b_' + d] = (b_ih + b_hh).reshape(1, 4 * H)
    return p


# ---------------- pure-JAX reference for correctness check ----------------
def _lstm_dir_ref(x_tm, lens2d, wih_t, whh_t, b2d, reverse):
    T2, B, _ = x_tm.shape
    H = whh_t.shape[0]

    def step(carry, t):
        h, c = carry
        ta = (T2 - 1 - t) if reverse else t
        xt = x_tm[ta]
        gates = xt @ wih_t + h @ whh_t + b2d
        i = jax.nn.sigmoid(gates[:, :H])
        f = jax.nn.sigmoid(gates[:, H:2 * H])
        g = jnp.tanh(gates[:, 2 * H:3 * H])
        o = jax.nn.sigmoid(gates[:, 3 * H:])
        cn = f * c + i * g
        hn = o * jnp.tanh(cn)
        m = ta < lens2d
        return (jnp.where(m, hn, h), jnp.where(m, cn, c)), jnp.where(m, hn, 0.0)

    init = (jnp.zeros((B, H), jnp.float32), jnp.zeros((B, H), jnp.float32))
    _, outs = lax.scan(step, init, jnp.arange(T2))
    return jnp.flip(outs, 0) if reverse else outs


def pblstm_ref(x, lx, params):
    B, T, D = x.shape
    T_even = (T // 2) * 2
    x_r = x[:, :T_even, :].reshape(B, T_even // 2, 2 * D)
    lx2 = (lx // 2).astype(jnp.int32)
    x_tm = jnp.transpose(x_r, (1, 0, 2))
    lens2d = lx2.reshape(B, 1)
    h_f = _lstm_dir_ref(x_tm, lens2d, params['wih_f'], params['whh_f'],
                        params['b_f'], False)
    h_b = _lstm_dir_ref(x_tm, lens2d, params['wih_b'], params['whh_b'],
                        params['b_b'], True)
    return jnp.transpose(jnp.concatenate([h_f, h_b], axis=-1), (1, 0, 2)), lx2


if __name__ == "__main__":
    key = jax.random.PRNGKey(0)
    B, T, D, H = 2, 9, 8, 16          # LSTM input_size = 2*D = 16, hidden = 16
    kx, kp = jax.random.split(key)

    x = jax.random.normal(kx, (B, T, D), jnp.float32)
    lx = jnp.array([9, 5], dtype=jnp.int32)          # variable lengths
    params = init_params(kp, 2 * D, H)

    out, lx2 = pblstm_forward(x, lx, params)
    out = jax.block_until_ready(out)

    out_ref, lx2_ref = pblstm_ref(x, lx, params)
    assert out.shape == (B, T // 2, 2 * H)
    assert jnp.allclose(out, out_ref, atol=1e-4, rtol=1e-4), \
        float(jnp.max(jnp.abs(out - out_ref)))
    assert jnp.array_equal(lx2, lx2_ref)

    print("KERNEL_OK")
</pallas_src>

<mosaic_0001>
module attributes {stable_mosaic.version = 11 : i64} {
  func.func @_pblstm_kernel(%arg0: i32, %arg1: i32, %arg2: memref<8x1xi32, #tpu.memory_space<vmem>>, %arg3: memref<32x128xf32, #tpu.memory_space<vmem>>, %arg4: memref<1x128x512xf32, #tpu.memory_space<vmem>>, %arg5: memref<1x1x512xf32, #tpu.memory_space<vmem>>, %arg6: memref<1x128x512xf32, #tpu.memory_space<vmem>>, %arg7: memref<4x8x128xf32, #tpu.memory_space<vmem>>, %arg8: memref<8x128xf32, #tpu.memory_space<vmem>>, %arg9: memref<8x128xf32, #tpu.memory_space<vmem>>, %arg10: memref<32x512xf32, #tpu.memory_space<vmem>>) attributes {dimension_semantics = [#tpu.dimension_semantics<parallel>, #tpu.dimension_semantics<arbitrary>], iteration_bounds = array<i64: 2, 1>, scalar_prefetch = 0 : i64, scratch_operands = 3 : i64, tpu.core_type = #tpu.core_type<tc>, window_params = [{pipeline_mode = #tpu.pipeline_mode<synchronous>, transform_indices = @transform_0, window_bounds = array<i64: 8, 1>}, {transform_indices = @transform_1, window_bounds = array<i64: 32, 128>}, {transform_indices = @transform_2, window_bounds = array<i64: 1, 128, 512>}, {transform_indices = @transform_3, window_bounds = array<i64: 1, 1, 512>}, {transform_indices = @transform_4, window_bounds = array<i64: 1, 128, 512>}, {transform_indices = @transform_5, window_bounds = array<i64: 4, 8, 128>}]} {
    %c0_i32 = arith.constant 0 : i32
    %0 = arith.cmpi eq, %arg1, %c0_i32 : i32
    %1 = arith.extui %0 : i1 to i32
    %c0_i32_0 = arith.constant 0 : i32
    %2 = arith.cmpi ne, %1, %c0_i32_0 : i32
    scf.if %2 {
      %cst_79 = arith.constant 0.000000e+00 : f32
      %234 = vector.broadcast %cst_79 : f32 to vector<8x128xf32>
      %c0_80 = arith.constant 0 : index
      %c0_81 = arith.constant 0 : index
      %235 = vector.load %arg8[%c0_80, %c0_81] : memref<8x128xf32, #tpu.memory_space<vmem>>, vector<8x128xf32>
      tpu.vector_store %arg8[%c0_80, %c0_81], %234 {strides = array<i32>} : memref<8x128xf32, #tpu.memory_space<vmem>>, vector<8x128xf32>,
      %cst_82 = arith.constant 0.000000e+00 : f32
      %236 = vector.broadcast %cst_82 : f32 to vector<8x128xf32>
      %c0_83 = arith.constant 0 : index
      %c0_84 = arith.constant 0 : index
      %237 = vector.load %arg9[%c0_83, %c0_84] : memref<8x128xf32, #tpu.memory_space<vmem>>, vector<8x128xf32>
      tpu.vector_store %arg9[%c0_83, %c0_84], %236 {strides = array<i32>} : memref<8x128xf32, #tpu.memory_space<vmem>>, vector<8x128xf32>,
    } else {
    }
    %c0 = arith.constant 0 : index
    %c0_1 = arith.constant 0 : index
    %3 = vector.load %arg3[%c0, %c0_1] : memref<32x128xf32, #tpu.memory_space<vmem>>, vector<32x128xf32>
    %c0_2 = arith.constant 0 : index
    %c0_3 = arith.constant 0 : index
    %c0_4 = arith.constant 0 : index
    %4 = vector.load %arg4[%c0_2, %c0_3, %c0_4] : memref<1x128x512xf32, #tpu.memory_space<vmem>>, vector<1x128x512xf32>
    %5 = vector.shape_cast %4 : vector<1x128x512xf32> to vector<128x512xf32>
    %cst = arith.constant dense<0.000000e+00> : vector<32x512xf32>
    %6 = tpu.matmul %3, %5, %cst {dimension_numbers = #tpu.dot_dimension_numbers<[1], [0], [0], [1], [0, 0, 1, 1], [], []>} : vector<32x128xf32>, vector<128x512xf32>, vector<32x512xf32> -> vector<32x512xf32>
    %c0_5 = arith.constant 0 : index
    %c0_6 = arith.constant 0 : index
    %c0_7 = arith.constant 0 : index
    %7 = vector.load %arg5[%c0_5, %c0_6, %c0_7] : memref<1x1x512xf32, #tpu.memory_space<vmem>>, vector<1x1x512xf32>
    %8 = vector.shape_cast %7 : vector<1x1x512xf32> to vector<1x512xf32>
    %9 = vector.broadcast %8 : vector<1x512xf32> to vector<32x512xf32>
    %10 = arith.addf %6, %9 : vector<32x512xf32>
    %c0_8 = arith.constant 0 : index
    %c0_9 = arith.constant 0 : index
    %11 = vector.load %arg10[%c0_8, %c0_9] : memref<32x512xf32, #tpu.memory_space<vmem>>, vector<32x512xf32>
    tpu.vector_store %arg10[%c0_8, %c0_9], %10 {strides = array<i32>} : memref<32x512xf32, #tpu.memory_space<vmem>>, vector<32x512xf32>,
    %c0_10 = arith.constant 0 : index
    %c0_11 = arith.constant 0 : index
    %12 = vector.load %arg2[%c0_10, %c0_11] : memref<8x1xi32, #tpu.memory_space<vmem>>, vector<8x1xi32>
    %c2_i32 = arith.constant 2 : i32
    %13 = arith.muli %c2_i32, %arg1 : i32
    %c0_i32_12 = arith.constant 0 : i32
    %14 = arith.subi %c0_i32_12, %13 : i32
    %15 = arith.muli %arg0, %14 : i32
    %16 = arith.addi %arg1, %15 : i32
    %c4_i32 = arith.constant 4 : i32
    %17 = arith.muli %16, %c4_i32 : i32
    %c0_13 = arith.constant 0 : index
    %c0_14 = arith.constant 0 : index
    %18 = vector.load %arg8[%c0_13, %c0_14] : memref<8x128xf32, #tpu.memory_space<vmem>>, vector<8x128xf32>
    %c0_15 = arith.constant 0 : index
    %c0_16 = arith.constant 0 : index
    %19 = vector.load %arg9[%c0_15, %c0_16] : memref<8x128xf32, #tpu.memory_space<vmem>>, vector<8x128xf32>
    %c0_i32_17 = arith.constant 0 : i32
    %c0_i32_18 = arith.constant 0 : i32
    %20 = arith.cmpi eq, %arg0, %c0_i32_18 : i32
    %c3_i32 = arith.constant 3 : i32
    %21 = arith.subi %c3_i32, %c0_i32_17 : i32
    %22 = arith.select %20, %c0_i32_17, %21 : i32
    %c8_i32 = arith.constant 8 : i32
    %23 = arith.muli %22, %c8_i32 : i32
    %24 = tpu.assume_multiple %23, 8 : i32
    %25 = arith.index_cast %24 : i32 to index
    %c0_19 = arith.constant 0 : index
    %26 = vector.load %arg10[%25, %c0_19] : memref<32x512xf32, #tpu.memory_space<vmem>>, vector<8x512xf32>
    %c0_20 = arith.constant 0 : index
    %c0_21 = arith.constant 0 : index
    %c0_22 = arith.constant 0 : index
    %27 = vector.load %arg6[%c0_20, %c0_21, %c0_22] : memref<1x128x512xf32, #tpu.memory_space<vmem>>, vector<1x128x512xf32>
    %28 = vector.shape_cast %27 : vector<1x128x512xf32> to vector<128x512xf32>
    %cst_23 = arith.constant dense<0.000000e+00> : vector<8x512xf32>
    %29 = tpu.matmul %18, %28, %cst_23 {dimension_numbers = #tpu.dot_dimension_numbers<[1], [0], [0], [1], [0, 0, 1, 1], [], []>} : vector<8x128xf32>, vector<128x512xf32>, vector<8x512xf32> -> vector<8x512xf32>
    %30 = arith.addf %26, %29 : vector<8x512xf32>
    %31 = vector.extract_strided_slice %30 {offsets = [0, 0], sizes = [8, 128], strides = [1, 1]} : vector<8x512xf32> to vector<8x128xf32>
    %32 = arith.negf %31 : vector<8x128xf32>
    %33 = math.exp %32 : vector<8x128xf32>
    %cst_24 = arith.constant 1.000000e+00 : f32
    %34 = vector.broadcast %cst_24 : f32 to vector<8x128xf32>
    %35 = arith.addf %34, %33 : vector<8x128xf32>
    %36 = arith.divf %34, %35 : vector<8x128xf32>
    %37 = vector.extract_strided_slice %30 {offsets = [0, 128], sizes = [8, 128], strides = [1, 1]} : vector<8x512xf32> to vector<8x128xf32>
    %38 = arith.negf %37 : vector<8x128xf32>
    %39 = math.exp %38 : vector<8x128xf32>
    %cst_25 = arith.constant 1.000000e+00 : f32
    %40 = vector.broadcast %cst_25 : f32 to vector<8x128xf32>
    %41 = arith.addf %40, %39 : vector<8x128xf32>
    %42 = arith.divf %40, %41 : vector<8x128xf32>
    %43 = vector.extract_strided_slice %30 {offsets = [0, 256], sizes = [8, 128], strides = [1, 1]} : vector<8x512xf32> to vector<8x128xf32>
    %44 = math.tanh %43 : vector<8x128xf32>
    %45 = vector.extract_strided_slice %30 {offsets = [0, 384], sizes = [8, 128], strides = [1, 1]} : vector<8x512xf32> to vector<8x128xf32>
    %46 = arith.negf %45 : vector<8x128xf32>
    %47 = math.exp %46 : vector<8x128xf32>
    %cst_26 = arith.constant 1.000000e+00 : f32
    %48 = vector.broadcast %cst_26 : f32 to vector<8x128xf32>
    %49 = arith.addf %48, %47 : vector<8x128xf32>
    %50 = arith.divf %48, %49 : vector<8x128xf32>
    %51 = arith.mulf %42, %19 : vector<8x128xf32>
    %52 = arith.mulf %36, %44 : vector<8x128xf32>
    %53 = arith.addf %51, %52 : vector<8x128xf32>
    %54 = math.tanh %53 : vector<8x128xf32>
    %55 = arith.mulf %50, %54 : vector<8x128xf32>
    %56 = arith.addi %17, %22 : i32
    %57 = vector.broadcast %56 : i32 to vector<8x1xi32>
    %58 = arith.cmpi slt, %57, %12 : vector<8x1xi32>
    %cst_27 = arith.constant 0.000000e+00 : f32
    %59 = vector.broadcast %cst_27 : f32 to vector<8x128xf32>
    %60 = vector.shape_cast %58 : vector<8x1xi1> to vector<8x1xi1>
    %61 = vector.broadcast %60 : vector<8x1xi1> to vector<8x128xi1>
    %62 = arith.select %61, %55, %59 : vector<8x128xi1>, vector<8x128xf32>
    %63 = arith.index_cast %22 : i32 to index
    %c0_28 = arith.constant 0 : index
    %c0_29 = arith.constant 0 : index
    %64 = vector.load %arg7[%63, %c0_28, %c0_29] : memref<4x8x128xf32, #tpu.memory_space<vmem>>, vector<1x8x128xf32>
    %65 = vector.shape_cast %64 : vector<1x8x128xf32> to vector<8x128xf32>
    %66 = vector.shape_cast %62 : vector<8x128xf32> to vector<1x8x128xf32>
    tpu.vector_store %arg7[%63, %c0_28, %c0_29], %66 {strides = array<i32>} : memref<4x8x128xf32, #tpu.memory_space<vmem>>, vector<1x8x128xf32>,
    %67 = vector.shape_cast %58 : vector<8x1xi1> to vector<8x1xi1>
    %68 = vector.broadcast %67 : vector<8x1xi1> to vector<8x128xi1>
    %69 = arith.select %68, %55, %18 : vector<8x128xi1>, vector<8x128xf32>
    %70 = vector.shape_cast %58 : vector<8x1xi1> to vector<8x1xi1>
    %71 = vector.broadcast %70 : vector<8x1xi1> to vector<8x128xi1>
    %72 = arith.select %71, %53, %19 : vector<8x128xi1>, vector<8x128xf32>
    %c1_i32 = arith.constant 1 : i32
    %c0_i32_30 = arith.constant 0 : i32
    %73 = arith.cmpi eq, %arg0, %c0_i32_30 : i32
    %c3_i32_31 = arith.constant 3 : i32
    %74 = arith.subi %c3_i32_31, %c1_i32 : i32
    %75 = arith.select %73, %c1_i32, %74 : i32
    %c8_i32_32 = arith.constant 8 : i32
    %76 = arith.muli %75, %c8_i32_32 : i32
    %77 = tpu.assume_multiple %76, 8 : i32
    %78 = arith.index_cast %77 : i32 to index
    %c0_33 = arith.constant 0 : index
    %79 = vector.load %arg10[%78, %c0_33] : memref<32x512xf32, #tpu.memory_space<vmem>>, vector<8x512xf32>
    %c0_34 = arith.constant 0 : index
    %c0_35 = arith.constant 0 : index
    %c0_36 = arith.constant 0 : index
    %80 = vector.load %arg6[%c0_34, %c0_35, %c0_36] : memref<1x128x512xf32, #tpu.memory_space<vmem>>, vector<1x128x512xf32>
    %81 = vector.shape_cast %80 : vector<1x128x512xf32> to vector<128x512xf32>
    %cst_37 = arith.constant dense<0.000000e+00> : vector<8x512xf32>
    %82 = tpu.matmul %69, %81, %cst_37 {dimension_numbers = #tpu.dot_dimension_numbers<[1], [0], [0], [1], [0, 0, 1, 1], [], []>} : vector<8x128xf32>, vector<128x512xf32>, vector<8x512xf32> -> vector<8x512xf32>
    %83 = arith.addf %79, %82 : vector<8x512xf32>
    %84 = vector.extract_strided_slice %83 {offsets = [0, 0], sizes = [8, 128], strides = [1, 1]} : vector<8x512xf32> to vector<8x128xf32>
    %85 = arith.negf %84 : vector<8x128xf32>
    %86 = math.exp %85 : vector<8x128xf32>
    %cst_38 = arith.constant 1.000000e+00 : f32
    %87 = vector.broadcast %cst_38 : f32 to vector<8x128xf32>
    %88 = arith.addf %87, %86 : vector<8x128xf32>
    %89 = arith.divf %87, %88 : vector<8x128xf32>
    %90 = vector.extract_strided_slice %83 {offsets = [0, 128], sizes = [8, 128], strides = [1, 1]} : vector<8x512xf32> to vector<8x128xf32>
    %91 = arith.negf %90 : vector<8x128xf32>
    %92 = math.exp %91 : vector<8x128xf32>
    %cst_39 = arith.constant 1.000000e+00 : f32
    %93 = vector.broadcast %cst_39 : f32 to vector<8x128xf32>
    %94 = arith.addf %93, %92 : vector<8x128xf32>
    %95 = arith.divf %93, %94 : vector<8x128xf32>
    %96 = vector.extract_strided_slice %83 {offsets = [0, 256], sizes = [8, 128], strides = [1, 1]} : vector<8x512xf32> to vector<8x128xf32>
    %97 = math.tanh %96 : vector<8x128xf32>
    %98 = vector.extract_strided_slice %83 {offsets = [0, 384], sizes = [8, 128], strides = [1, 1]} : vector<8x512xf32> to vector<8x128xf32>
    %99 = arith.negf %98 : vector<8x128xf32>
    %100 = math.exp %99 : vector<8x128xf32>
    %cst_40 = arith.constant 1.000000e+00 : f32
    %101 = vector.broadcast %cst_40 : f32 to vector<8x128xf32>
    %102 = arith.addf %101, %100 : vector<8x128xf32>
    %103 = arith.divf %101, %102 : vector<8x128xf32>
    %104 = arith.mulf %95, %72 : vector<8x128xf32>
    %105 = arith.mulf %89, %97 : vector<8x128xf32>
    %106 = arith.addf %104, %105 : vector<8x128xf32>
    %107 = math.tanh %106 : vector<8x128xf32>
    %108 = arith.mulf %103, %107 : vector<8x128xf32>
    %109 = arith.addi %17, %75 : i32
    %110 = vector.broadcast %109 : i32 to vector<8x1xi32>
    %111 = arith.cmpi slt, %110, %12 : vector<8x1xi32>
    %cst_41 = arith.constant 0.000000e+00 : f32
    %112 = vector.broadcast %cst_41 : f32 to vector<8x128xf32>
    %113 = vector.shape_cast %111 : vector<8x1xi1> to vector<8x1xi1>
    %114 = vector.broadcast %113 : vector<8x1xi1> to vector<8x128xi1>
    %115 = arith.select %114, %108, %112 : vector<8x128xi1>, vector<8x128xf32>
    %116 = arith.index_cast %75 : i32 to index
    %c0_42 = arith.constant 0 : index
    %c0_43 = arith.constant 0 : index
    %117 = vector.load %arg7[%116, %c0_42, %c0_43] : memref<4x8x128xf32, #tpu.memory_space<vmem>>, vector<1x8x128xf32>
    %118 = vector.shape_cast %117 : vector<1x8x128xf32> to vector<8x128xf32>
    %119 = vector.shape_cast %115 : vector<8x128xf32> to vector<1x8x128xf32>
    tpu.vector_store %arg7[%116, %c0_42, %c0_43], %119 {strides = array<i32>} : memref<4x8x128xf32, #tpu.memory_space<vmem>>, vector<1x8x128xf32>,
    %120 = vector.shape_cast %111 : vector<8x1xi1> to vector<8x1xi1>
    %121 = vector.broadcast %120 : vector<8x1xi1> to vector<8x128xi1>
    %122 = arith.select %121, %108, %69 : vector<8x128xi1>, vector<8x128xf32>
    %123 = vector.shape_cast %111 : vector<8x1xi1> to vector<8x1xi1>
    %124 = vector.broadcast %123 : vector<8x1xi1> to vector<8x128xi1>
    %125 = arith.select %124, %106, %72 : vector<8x128xi1>, vector<8x128xf32>
    %c2_i32_44 = arith.constant 2 : i32
    %c0_i32_45 = arith.constant 0 : i32
    %126 = arith.cmpi eq, %arg0, %c0_i32_45 : i32
    %c3_i32_46 = arith.constant 3 : i32
    %127 = arith.subi %c3_i32_46, %c2_i32_44 : i32
    %128 = arith.select %126, %c2_i32_44, %127 : i32
    %c8_i32_47 = arith.constant 8 : i32
    %129 = arith.muli %128, %c8_i32_47 : i32
    %130 = tpu.assume_multiple %129, 8 : i32
    %131 = arith.index_cast %130 : i32 to index
    %c0_48 = arith.constant 0 : index
    %132 = vector.load %arg10[%131, %c0_48] : memref<32x512xf32, #tpu.memory_space<vmem>>, vector<8x512xf32>
    %c0_49 = arith.constant 0 : index
    %c0_50 = arith.constant 0 : index
    %c0_51 = arith.constant 0 : index
    %133 = vector.load %arg6[%c0_49, %c0_50, %c0_51] : memref<1x128x512xf32, #tpu.memory_space<vmem>>, vector<1x128x512xf32>
    %134 = vector.shape_cast %133 : vector<1x128x512xf32> to vector<128x512xf32>
    %cst_52 = arith.constant dense<0.000000e+00> : vector<8x512xf32>
    %135 = tpu.matmul %122, %134, %cst_52 {dimension_numbers = #tpu.dot_dimension_numbers<[1], [0], [0], [1], [0, 0, 1, 1], [], []>} : vector<8x128xf32>, vector<128x512xf32>, vector<8x512xf32> -> vector<8x512xf32>
    %136 = arith.addf %132, %135 : vector<8x512xf32>
    %137 = vector.extract_strided_slice %136 {offsets = [0, 0], sizes = [8, 128], strides = [1, 1]} : vector<8x512xf32> to vector<8x128xf32>
    %138 = arith.negf %137 : vector<8x128xf32>
    %139 = math.exp %138 : vector<8x128xf32>
    %cst_53 = arith.constant 1.000000e+00 : f32
    %140 = vector.broadcast %cst_53 : f32 to vector<8x128xf32>
    %141 = arith.addf %140, %139 : vector<8x128xf32>
    %142 = arith.divf %140, %141 : vector<8x128xf32>
    %143 = vector.extract_strided_slice %136 {offsets = [0, 128], sizes = [8, 128], strides = [1, 1]} : vector<8x512xf32> to vector<8x128xf32>
    %144 = arith.negf %143 : vector<8x128xf32>
    %145 = math.exp %144 : vector<8x128xf32>
    %cst_54 = arith.constant 1.000000e+00 : f32
    %146 = vector.broadcast %cst_54 : f32 to vector<8x128xf32>
    %147 = arith.addf %146, %145 : vector<8x128xf32>
    %148 = arith.divf %146, %147 : vector<8x128xf32>
    %149 = vector.extract_strided_slice %136 {offsets = [0, 256], sizes = [8, 128], strides = [1, 1]} : vector<8x512xf32> to vector<8x128xf32>
    %150 = math.tanh %149 : vector<8x128xf32>
    %151 = vector.extract_strided_slice %136 {offsets = [0, 384], sizes = [8, 128], strides = [1, 1]} : vector<8x512xf32> to vector<8x128xf32>
    %152 = arith.negf %151 : vector<8x128xf32>
    %153 = math.exp %152 : vector<8x128xf32>
    %cst_55 = arith.constant 1.000000e+00 : f32
    %154 = vector.broadcast %cst_55 : f32 to vector<8x128xf32>
    %155 = arith.addf %154, %153 : vector<8x128xf32>
    %156 = arith.divf %154, %155 : vector<8x128xf32>
    %157 = arith.mulf %148, %125 : vector<8x128xf32>
    %158 = arith.mulf %142, %150 : vector<8x128xf32>
    %159 = arith.addf %157, %158 : vector<8x128xf32>
    %160 = math.tanh %159 : vector<8x128xf32>
    %161 = arith.mulf %156, %160 : vector<8x128xf32>
    %162 = arith.addi %17, %128 : i32
    %163 = vector.broadcast %162 : i32 to vector<8x1xi32>
    %164 = arith.cmpi slt, %163, %12 : vector<8x1xi32>
    %cst_56 = arith.constant 0.000000e+00 : f32
    %165 = vector.broadcast %cst_56 : f32 to vector<8x128xf32>
    %166 = vector.shape_cast %164 : vector<8x1xi1> to vector<8x1xi1>
    %167 = vector.broadcast %166 : vector<8x1xi1> to vector<8x128xi1>
    %168 = arith.select %167, %161, %165 : vector<8x128xi1>, vector<8x128xf32>
    %169 = arith.index_cast %128 : i32 to index
    %c0_57 = arith.constant 0 : index
    %c0_58 = arith.constant 0 : index
    %170 = vector.load %arg7[%169, %c0_57, %c0_58] : memref<4x8x128xf32, #tpu.memory_space<vmem>>, vector<1x8x128xf32>
    %171 = vector.shape_cast %170 : vector<1x8x128xf32> to vector<8x128xf32>
    %172 = vector.shape_cast %168 : vector<8x128xf32> to vector<1x8x128xf32>
    tpu.vector_store %arg7[%169, %c0_57, %c0_58], %172 {strides = array<i32>} : memref<4x8x128xf32, #tpu.memory_space<vmem>>, vector<1x8x128xf32>,
    %173 = vector.shape_cast %164 : vector<8x1xi1> to vector<8x1xi1>
    %174 = vector.broadcast %173 : vector<8x1xi1> to vector<8x128xi1>
    %175 = arith.select %174, %161, %122 : vector<8x128xi1>, vector<8x128xf32>
    %176 = vector.shape_cast %164 : vector<8x1xi1> to vector<8x1xi1>
    %177 = vector.broadcast %176 : vector<8x1xi1> to vector<8x128xi1>
    %178 = arith.select %177, %159, %125 : vector<8x128xi1>, vector<8x128xf32>
    %c3_i32_59 = arith.constant 3 : i32
    %c0_i32_60 = arith.constant 0 : i32
    %179 = arith.cmpi eq, %arg0, %c0_i32_60 : i32
    %c3_i32_61 = arith.constant 3 : i32
    %180 = arith.subi %c3_i32_61, %c3_i32_59 : i32
    %181 = arith.select %179, %c3_i32_59, %180 : i32
    %c8_i32_62 = arith.constant 8 : i32
    %182 = arith.muli %181, %c8_i32_62 : i32
    %183 = tpu.assume_multiple %182, 8 : i32
    %184 = arith.index_cast %183 : i32 to index
    %c0_63 = arith.constant 0 : index
    %185 = vector.load %arg10[%184, %c0_63] : memref<32x512xf32, #tpu.memory_space<vmem>>, vector<8x512xf32>
    %c0_64 = arith.constant 0 : index
    %c0_65 = arith.constant 0 : index
    %c0_66 = arith.constant 0 : index
    %186 = vector.load %arg6[%c0_64, %c0_65, %c0_66] : memref<1x128x512xf32, #tpu.memory_space<vmem>>, vector<1x128x512xf32>
    %187 = vector.shape_cast %186 : vector<1x128x512xf32> to vector<128x512xf32>
    %cst_67 = arith.constant dense<0.000000e+00> : vector<8x512xf32>
    %188 = tpu.matmul %175, %187, %cst_67 {dimension_numbers = #tpu.dot_dimension_numbers<[1], [0], [0], [1], [0, 0, 1, 1], [], []>} : vector<8x128xf32>, vector<128x512xf32>, vector<8x512xf32> -> vector<8x512xf32>
    %189 = arith.addf %185, %188 : vector<8x512xf32>
    %190 = vector.extract_strided_slice %189 {offsets = [0, 0], sizes = [8, 128], strides = [1, 1]} : vector<8x512xf32> to vector<8x128xf32>
    %191 = arith.negf %190 : vector<8x128xf32>
    %192 = math.exp %191 : vector<8x128xf32>
    %cst_68 = arith.constant 1.000000e+00 : f32
    %193 = vector.broadcast %cst_68 : f32 to vector<8x128xf32>
    %194 = arith.addf %193, %192 : vector<8x128xf32>
    %195 = arith.divf %193, %194 : vector<8x128xf32>
    %196 = vector.extract_strided_slice %189 {offsets = [0, 128], sizes = [8, 128], strides = [1, 1]} : vector<8x512xf32> to vector<8x128xf32>
    %197 = arith.negf %196 : vector<8x128xf32>
    %198 = math.exp %197 : vector<8x128xf32>
    %cst_69 = arith.constant 1.000000e+00 : f32
    %199 = vector.broadcast %cst_69 : f32 to vector<8x128xf32>
    %200 = arith.addf %199, %198 : vector<8x128xf32>
    %201 = arith.divf %199, %200 : vector<8x128xf32>
    %202 = vector.extract_strided_slice %189 {offsets = [0, 256], sizes = [8, 128], strides = [1, 1]} : vector<8x512xf32> to vector<8x128xf32>
    %203 = math.tanh %202 : vector<8x128xf32>
    %204 = vector.extract_strided_slice %189 {offsets = [0, 384], sizes = [8, 128], strides = [1, 1]} : vector<8x512xf32> to vector<8x128xf32>
    %205 = arith.negf %204 : vector<8x128xf32>
    %206 = math.exp %205 : vector<8x128xf32>
    %cst_70 = arith.constant 1.000000e+00 : f32
    %207 = vector.broadcast %cst_70 : f32 to vector<8x128xf32>
    %208 = arith.addf %207, %206 : vector<8x128xf32>
    %209 = arith.divf %207, %208 : vector<8x128xf32>
    %210 = arith.mulf %201, %178 : vector<8x128xf32>
    %211 = arith.mulf %195, %203 : vector<8x128xf32>
    %212 = arith.addf %210, %211 : vector<8x128xf32>
    %213 = math.tanh %212 : vector<8x128xf32>
    %214 = arith.mulf %209, %213 : vector<8x128xf32>
    %215 = arith.addi %17, %181 : i32
    %216 = vector.broadcast %215 : i32 to vector<8x1xi32>
    %217 = arith.cmpi slt, %216, %12 : vector<8x1xi32>
    %cst_71 = arith.constant 0.000000e+00 : f32
    %218 = vector.broadcast %cst_71 : f32 to vector<8x128xf32>
    %219 = vector.shape_cast %217 : vector<8x1xi1> to vector<8x1xi1>
    %220 = vector.broadcast %219 : vector<8x1xi1> to vector<8x128xi1>
    %221 = arith.select %220, %214, %218 : vector<8x128xi1>, vector<8x128xf32>
    %222 = arith.index_cast %181 : i32 to index
    %c0_72 = arith.constant 0 : index
    %c0_73 = arith.constant 0 : index
    %223 = vector.load %arg7[%222, %c0_72, %c0_73] : memref<4x8x128xf32, #tpu.memory_space<vmem>>, vector<1x8x128xf32>
    %224 = vector.shape_cast %223 : vector<1x8x128xf32> to vector<8x128xf32>
    %225 = vector.shape_cast %221 : vector<8x128xf32> to vector<1x8x128xf32>
    tpu.vector_store %arg7[%222, %c0_72, %c0_73], %225 {strides = array<i32>} : memref<4x8x128xf32, #tpu.memory_space<vmem>>, vector<1x8x128xf32>,
    %226 = vector.shape_cast %217 : vector<8x1xi1> to vector<8x1xi1>
    %227 = vector.broadcast %226 : vector<8x1xi1> to vector<8x128xi1>
    %228 = arith.select %227, %214, %175 : vector<8x128xi1>, vector<8x128xf32>
    %229 = vector.shape_cast %217 : vector<8x1xi1> to vector<8x1xi1>
    %230 = vector.broadcast %229 : vector<8x1xi1> to vector<8x128xi1>
    %231 = arith.select %230, %212, %178 : vector<8x128xi1>, vector<8x128xf32>
    %c4_i32_74 = arith.constant 4 : i32
    %c0_75 = arith.constant 0 : index
    %c0_76 = arith.constant 0 : index
    %232 = vector.load %arg8[%c0_75, %c0_76] : memref<8x128xf32, #tpu.memory_space<vmem>>, vector<8x128xf32>
    tpu.vector_store %arg8[%c0_75, %c0_76], %228 {strides = array<i32>} : memref<8x128xf32, #tpu.memory_space<vmem>>, vector<8x128xf32>,
    %c0_77 = arith.constant 0 : index
    %c0_78 = arith.constant 0 : index
    %233 = vector.load %arg9[%c0_77, %c0_78] : memref<8x128xf32, #tpu.memory_space<vmem>>, vector<8x128xf32>
    tpu.vector_store %arg9[%c0_77, %c0_78], %231 {strides = array<i32>} : memref<8x128xf32, #tpu.memory_space<vmem>>, vector<8x128xf32>,
    return
  }
  func.func @transform_0(%arg0: i32, %arg1: i32) -> (i32, i32) {
    %c0_i32 = arith.constant 0 : i32
    %c0_i32_0 = arith.constant 0 : i32
    %c0_i32_1 = arith.constant 0 : i32
    return %c0_i32, %c0_i32_0 : i32, i32
  }
  func.func @transform_1(%arg0: i32, %arg1: i32) -> (i32, i32) {
    %c2_i32 = arith.constant 2 : i32
    %0 = arith.muli %c2_i32, %arg1 : i32
    %c0_i32 = arith.constant 0 : i32
    %1 = arith.subi %c0_i32, %0 : i32
    %2 = arith.muli %arg0, %1 : i32
    %3 = arith.addi %arg1, %2 : i32
    %c0_i32_0 = arith.constant 0 : i32
    %c0_i32_1 = arith.constant 0 : i32
    return %3, %c0_i32_0 : i32, i32
  }
  func.func @transform_2(%arg0: i32, %arg1: i32) -> (i32, i32, i32) {
    %c0_i32 = arith.constant 0 : i32
    %c0_i32_0 = arith.constant 0 : i32
    %c0_i32_1 = arith.constant 0 : i32
    return %arg0, %c0_i32, %c0_i32_0 : i32, i32, i32
  }
  func.func @transform_3(%arg0: i32, %arg1: i32) -> (i32, i32, i32) {
    %c0_i32 = arith.constant 0 : i32
    %c0_i32_0 = arith.constant 0 : i32
    %c0_i32_1 = arith.constant 0 : i32
    return %arg0, %c0_i32, %c0_i32_0 : i32, i32, i32
  }
  func.func @transform_4(%arg0: i32, %arg1: i32) -> (i32, i32, i32) {
    %c0_i32 = arith.constant 0 : i32
    %c0_i32_0 = arith.constant 0 : i32
    %c0_i32_1 = arith.constant 0 : i32
    return %arg0, %c0_i32, %c0_i32_0 : i32, i32, i32
  }
  func.func @transform_5(%arg0: i32, %arg1: i32) -> (i32, i32, i32) {
    %c2_i32 = arith.constant 2 : i32
    %0 = arith.muli %c2_i32, %arg1 : i32
    %c0_i32 = arith.constant 0 : i32
    %1 = arith.subi %c0_i32, %0 : i32
    %2 = arith.muli %arg0, %1 : i32
    %3 = arith.addi %arg1, %2 : i32
    %c0_i32_0 = arith.constant 0 : i32
    %c0_i32_1 = arith.constant 0 : i32
    return %3, %c0_i32_0, %arg0 : i32, i32, i32
  }
}

</mosaic_0001>

<bundles_post_ra>
// kernel: tpu_custom_call.1
= control target key start
LH: loop header
LB: loop body
LE: loop exit
PB: predicated region body
PF: predicated region fallthrough
CT: control target
= control target key end

     0   :  { %s3144_s0 = inlined_call_operand.vmem [shape: s32[8,1], index: 0, kind: input, shape index: {}]   ;;  %s3145_s1 = inlined_call_operand.hbm [shape: f32[32,128], index: 1, kind: input, shape index: {}]   ;;  %s3146_s2 = inlined_call_operand.hbm [shape: f32[2,128,512], index: 2, kind: input, shape index: {}]   ;;  %s3147_s3 = inlined_call_operand.vmem [shape: f32[2,1,512], index: 3, kind: input, shape index: {}]   ;;  %s3148_s4 = inlined_call_operand.hbm [shape: f32[2,128,512], index: 4, kind: input, shape index: {}]   ;;  %s3149_s5 = inlined_call_operand.hbm [shape: f32[4,8,256], index: 5, kind: output, shape index: {}]  }
   0x1   :  { %3189 = sst [smem:[#allocation37_spill]] %s3146_s2 }
   0x2   :  { %10 = vsyncpa [#allocation6], 0 }
   0x3   :  { %12 = vsyncpa [#allocation6 + $0x1], 0 }
   0x4   :  { %13 = vsyncpa [#allocation9], 0 }
   0x5   :  { %15 = vsyncpa [#allocation9 + $0x1], 0 }
   0x6   :  { %16 = vsyncpa [#allocation7], 0 }
   0x7   :  { %18 = vsyncpa [#allocation7 + $0x1], 0  ;;  %s2306_s18 = smov 0   ;;  %s2308_s19 = smov 0  }
   0x8   :  { %s2310_s20 = smov 0   ;;  %s2312_s21 = smov 0  }
   0x9   :  { %s2314_s22 = smov 0   ;;  %s2316_s23 = smov 0  }
   0xa LB: > { %3190 = sst [smem:[#allocation15_spill]] %s2257_s22  ;;  %s2337_s24 = sadd.s32 4294967295, %s2261_s23   ;;  %s2261_s23 = sphi %s2316_s23, %s24_s23   ;;  %s2257_s22 = sphi %s2314_s22, %s3258_s22   ;;  %s2253_s21 = sphi %s2312_s21, %s3257_s21   ;;  %s2249_s20 = sphi %s2310_s20, %s3261_s20   ;;  %s2245_s19 = sphi %s2308_s19, %s3260_s19   ;;  %s2241_s18 = sphi %s2306_s18, %s3259_s18  }
   0xb   : > { %s1891_s25 = sadd.s32 4294967294, %s2261_s23   ;;  %s36_s26 = sadd.s32 1, %s2257_s22 }
   0xc   : > { %s98_s27 = sadd.s32 1, %s2249_s20  ;;  %p38_p0 = scmp.ge.s32.totalorder %s36_s26, 2 }
   0xd   : > { %p105_p1 = scmp.ne.s32.totalorder %s2249_s20, %s2245_s19  ;;  %p106_p2 = scmp.eq.s32.totalorder %s2261_s23, 0 }
   0xe   : > { %p111_p3 = scmp.ne.s32.totalorder %s2245_s19, %s2241_s18  ;;  %s3263_s26 = smov (%p38_p0, %s36_s26), 0 }
   0xf   : > { %3191 = sst [smem:[#allocation16_spill]] %s3263_s26  ;;  %p2351_p4 = por %p106_p2, %p105_p1 }
  0x10   : > { %p3150_p5 = scmp.eq.s32.totalorder %s2337_s24, 0  ;;  %s95_s29 = ssub.s32 %s2257_s22, %s3263_s26 }
  0x11   : > { %p197_p6 = scmp.eq.s32.totalorder %s2337_s24, 1  ;;  %p96_p7 = scmp.eq.s32.totalorder %s95_s29, 0 }
  0x12   : > { %p2361_p8 = por %p3150_p5, %p111_p3  ;;  %p203_p10 = scmp.eq.s32.totalorder %s1891_s25, 1 }
  0x13   : > { %p2365_p9 = por %p197_p6, %p105_p1  ;;  %p1967_p13 = scmp.lt.s32.totalorder %s2261_s23, 2 }
  0x14   : > { %s2370_s7 = scalar_select %p96_p7, %s2249_s20, %s98_s27  }
  0x15   : > { %s3194_s6 = scalar_select %p2365_p9, 1, 0 }
  0x16   : > { %p2372_p11 = por %p203_p10, %p111_p3  ;;  %s251_s9 = sand.u32 1, %s2261_s23  }
  0x17   : > { %s253_s10 = sand.u32 1, %s2249_s20   ;;  %s1935_s12 = sshll.u32 %s2257_s22, 13 }
  0x18   : > { %s3195_s8 = scalar_select %p2372_p11, 1, 0 }
  0x19   : > { %s2380_s11 = sshll.u32 %s253_s10, 9  ;;  %s3196_s2 = sld [smem:[#allocation37_spill]] }
  0x1a   : > { %s255_s16 = scalar_lea.vmem [#allocation8], %s2380_s11  ;;  %p2391_p0 = pnand %p1967_p13, %p2351_p4 }
  0x1b   : > { %s262_s17 = sshll.u32 %s255_s16, 4  ;;  %s2395_s27 = scalar_lea.sflag [#allocation9], %s251_s9  ;;  %s263_s17 = int_to_ptr.vmem [resolvable:$true] %s262_s17 }
  0x1c   : > { %p3153_p1 = pneg %p2391_p0  ;;  %s2108_s29 = scalar_lea.vmem %s263_s17, 8192 }
  0x1d   : > { %p2109_p3 = scmp.ne.s32.totalorder %s263_s17, %s2108_s29  ;;  %s2263_s10 = smov [#allocation8]  }
  0x1e   : > { %s2113_s13 = sshll.u32 %s2263_s10, 4  ;;  %s2114_s13 = int_to_ptr.vmem [resolvable:$false] %s2113_s13 }
  0x1f   : > { %s261_s15 = scalar_lea.hbm %s3196_s2, %s1935_s12  ;;  %p2111_p6 = pnand %p2109_p3, %p3153_p1 }
  0x20   : > { %s2115_s28 = scalar_lea.vmem %s2114_s13, 16384  ;;  %p2116_p4 = scmp.lt.s32.totalorder %s263_s17, %s2114_s13 }
  0x21   : > { %p2112_p7 = pneg %p2111_p6  ;;  %p2117_p10 = scmp.lt.s32.totalorder %s2115_s28, %s2108_s29 }
  0x23   : > { %p2118_p12 = por %p2117_p10, %p2116_p4 }
  0x25   : > { %p2119_p5 = pnand %p2118_p12, %p2112_p7 }
  0x27   : > { %2122 = shalt.err (!%p2119_p5)
}
  0x28   : > { %s3155_s14 = smov 512   ;;  %s2265_s9 = smov 32  }
  0x29   : > { %1959 = dma.hbm_to_vmem [thread:$0]  (!%p2391_p0), %s261_s15, 8192, %s263_s17, %s2395_s27, %s3155_s14, %s3155_s14, %s2265_s9  }
  0x2a   : > { %s2411_s29 = scalar_lea.hbm %s3148_s4, %s1935_s12  ;;  %s283_s13 = scalar_lea.vmem [#allocation10], %s2380_s11 }
  0x2b   : > { %s290_s28 = sshll.u32 %s283_s13, 4  ;;  %p1901_p5 = scmp.ge.s32.totalorder %s2261_s23, 1  ;;  %s2414_s28 = int_to_ptr.vmem [resolvable:$true] %s290_s28 }
  0x2c   : > { %p298_p12 = scmp.lt.s32.totalorder %s2261_s23, 3  ;;  %s2266_s26 = smov [#allocation5]  }
  0x2d   : > { %s241_s22 = sshll.u32 %s2266_s26, 4  ;;  %p2426_p6 = pnand %p1967_p13, %p106_p2  ;;  %s242_s22 = int_to_ptr.vmem [resolvable:$true] %s241_s22 }
  0x2e   : > { %p2418_p3 = pnand %p1901_p5, %p298_p12  ;;  %s2134_s11 = scalar_lea.vmem %s242_s22, 512 }
  0x2f   : > { %p2125_p7 = pneg %p2426_p6  ;;  %p2135_p4 = scmp.ne.s32.totalorder %s242_s22, %s2134_s11 }
  0x30   : > { %s2141_s12 = scalar_lea.vmem %s242_s22, 1024  ;;  %p2142_p5 = scmp.lt.s32.totalorder %s242_s22, %s242_s22 }
  0x31   : > { %p2137_p10 = pnand %p2135_p4, %p2125_p7  ;;  %p2143_p12 = scmp.lt.s32.totalorder %s2141_s12, %s2134_s11 }
  0x33   : > { %p2138_p1 = pneg %p2137_p10  ;;  %p2144_p11 = por %p2143_p12, %p2142_p5 }
  0x35   : > { %p2145_p9 = pnand %p2144_p11, %p2138_p1 }
  0x37   : > { %2148 = shalt.err (!%p2145_p9)
}
  0x38   : > { %s2267_s26 = smov 128   ;;  %s2268_s17 = smov 8  }
  0x39   : > { %1956 = dma.hbm_to_vmem [thread:$0]  (!%p2426_p6), %s3145_s1, 512, %s242_s22, [#allocation6], %s2267_s26, %s2267_s26, %s2268_s17  }
  0x3a   : > { %s2162_s13 = scalar_lea.vmem %s2414_s28, 8192  ;;  %p3200_p13 = pneg %p2391_p0 }
  0x3b   : > { %p2163_p2 = scmp.ne.s32.totalorder %s2414_s28, %s2162_s13  ;;  %s2269_s11 = smov [#allocation10]  }
  0x3c   : > { %s2167_s12 = sshll.u32 %s2269_s11, 4  ;;  %s2168_s12 = int_to_ptr.vmem [resolvable:$false] %s2167_s12 }
  0x3d   : > { %p2165_p7 = pnand %p2163_p2, %p3200_p13  ;;  %s2169_s14 = scalar_lea.vmem %s2168_s12, 16384 }
  0x3e   : > { %p2170_p9 = scmp.lt.s32.totalorder %s2414_s28, %s2168_s12  ;;  %p2171_p11 = scmp.lt.s32.totalorder %s2169_s14, %s2162_s13 }
  0x3f   : > { %p2166_p4 = pneg %p2165_p7 }
  0x40   : > { %p2172_p1 = por %p2171_p11, %p2170_p9 }
  0x42   : > { %p2173_p10 = pnand %p2172_p1, %p2166_p4 }
  0x44   : > { %2176 = shalt.err (!%p2173_p10)
}
  0x45   : > { %s3201_s15 = smov 512   ;;  %302 = sbr.rel (%p2418_p3) target bundleno = 1170 (0x492), region = 40 }
  0x46   : > { %1962 = dma.hbm_to_vmem [thread:$0]  (!%p2391_p0), %s2411_s29, 8192, %s2414_s28, %s2395_s27, %s3201_s15, %s3201_s15, %s2265_s9  }
  0x4a   : > { %p3202_p6 = scmp.eq.s32.totalorder %s2337_s24, 0 }
  0x4c   : > { %2228 = dma.done.wait (%p3202_p6), [#allocation6], 512   ;;  %p3203_p5 = pmov %p3202_p6 }
  0x4d   : > { %s313_s22 = sand.u32 1, %s2337_s24   ;;  %s2459_s25 = sand.u32 1, %s2245_s19  }
  0x4e   : > { %2230 = vsyncadd (%p3203_p5), [#allocation6], 4294966784  ;;  %s1903_s14 = sshll.u32 %s2459_s25, 9  ;;  %s314_s26 = scalar_lea.sflag [#allocation9], %s313_s22 }
  0x4f   : > { %s2464_s27 = scalar_lea.vmem [#allocation8], %s1903_s14 }
  0x50   : > { %2232 = dma.done.wait (%p2361_p8), %s314_s26, 16384  }
  0x51   : > { %2234 = vsyncadd (%p2361_p8), %s314_s26, 4294950912  ;;  %v3158_v0 = vmov 0.0   ;;  %v3156_v1 = vmov 0   ;;  %v452_v2 = vld [vmem:[%s2464_s27 + $0x1e8] sm:$0xff]  ;;  %v454_v3 = vld [vmem:[%s2464_s27 + $0x1f8] sm:$0xff]  ;;  %s2540_s2 = scalar_lea.vmem [#allocation10], %s1903_s14 }
  0x52   : > { %541 = vmatprep.mubr.f32.mxu0 %v3158_v0  ;;  %630 = vmatprep.mubr.f32.mxu1 %v3158_v0  ;;  %v451_v4 = vld [vmem:[%s2464_s27 + $0x1e0] sm:$0xff]  ;;  %v453_v5 = vld [vmem:[%s2464_s27 + $0x1f0] sm:$0xff]  ;;  %v448_v6 = vld [vmem:[%s2464_s27 + $0x1c8] sm:$0xff]  ;;  %p679_p8 = scmp.eq.s32.totalorder %s2253_s21, 0  ;;  %p372_p0 = scmp.lt.s32.totalorder %s2253_s21, 1 }
  0x53   : > { %2029 = vset.pattern.permute.xlu0 %v3156_v1  ;;  %2030 = vset.pattern.permute.xlu1 %v3156_v1  ;;  %v450_v7 = vld [vmem:[%s2464_s27 + $0x1d8] sm:$0xff]  ;;  %v447_v8 = vld [vmem:[%s2464_s27 + $0x1c0] sm:$0xff]  ;;  %v449_v9 = vld [vmem:[%s2464_s27 + $0x1d0] sm:$0xff]  ;;  %s1905_s14 = sshll.u32 %s2459_s25, 5  ;;  %p3254_p12 = scmp.ne.s32.totalorder %s3194_s6, 0 }
  0x54   : > { %477 = vmatprep.subr.mxu0 %v452_v2  ;;  %566 = vmatprep.subr.mxu1 %v454_v3  ;;  %v444_v10 = vld [vmem:[%s2464_s27 + $0x1a8] sm:$0xff]  ;;  %v446_v11 = vld [vmem:[%s2464_s27 + $0x1b8] sm:$0xff]  ;;  %v443_v12 = vld [vmem:[%s2464_s27 + $0x1a0] sm:$0xff]  ;;  %s2745_s24 = scalar_select %p679_p8, 0, 3 }
  0x55   : > { %478 = vmatpush1.msra.mxu0 %v451_v4  ;;  %567 = vmatpush1.msra.mxu1 %v453_v5  ;;  %v445_v13 = vld [vmem:[%s2464_s27 + $0x1b0] sm:$0xff]  ;;  %v440_v14 = vld [vmem:[%s2464_s27 + $0x188] sm:$0xff]  ;;  %v442_v15 = vld [vmem:[%s2464_s27 + $0x198] sm:$0xff]  ;;  %s2787_s29 = scalar_select %p679_p8, 1, 2 }
  0x56   : > { %479 = vmatprep.subr.mxu0 %v448_v6  ;;  %568 = vmatprep.subr.mxu1 %v450_v7  ;;  %v439_v16 = vld [vmem:[%s2464_s27 + $0x180] sm:$0xff]  ;;  %v441_v17 = vld [vmem:[%s2464_s27 + $0x190] sm:$0xff]  ;;  %v436_v18 = vld [vmem:[%s2464_s27 + $0x168] sm:$0xff]  ;;  %s373_s28 = scalar_select %p372_p0, %s2253_s21, 1 }
  0x57   : > { %480 = vmatpush1.msra.mxu0 %v447_v8  ;;  %569 = vmatpush1.msra.mxu1 %v449_v9  ;;  %v438_v19 = vld [vmem:[%s2464_s27 + $0x178] sm:$0xff]  ;;  %v435_v20 = vld [vmem:[%s2464_s27 + $0x160] sm:$0xff]  ;;  %v437_v21 = vld [vmem:[%s2464_s27 + $0x170] sm:$0xff]  ;;  %s1907_s11 = sshll.u32 %s2745_s24, 3  ;;  %s2907_s26 = scalar_lea.vmem [#allocation11], %s1905_s14 }
  0x58   : > { %481 = vmatprep.subr.mxu0 %v444_v10  ;;  %570 = vmatprep.subr.mxu1 %v446_v11  ;;  %v432_v22 = vld [vmem:[%s2464_s27 + $0x148] sm:$0xff]  ;;  %v434_v23 = vld [vmem:[%s2464_s27 + $0x158] sm:$0xff]  ;;  %v431_v24 = vld [vmem:[%s2464_s27 + $0x140] sm:$0xff]  ;;  %s1906_s17 = sshll.u32 %s373_s28, 2  ;;  %s682_s12 = sshra.s32 %s1907_s11, 3 }
  0x59   : > { %482 = vmatpush1.msra.mxu0 %v443_v12  ;;  %571 = vmatpush1.msra.mxu1 %v445_v13  ;;  %v433_v25 = vld [vmem:[%s2464_s27 + $0x150] sm:$0xff]  ;;  %v428_v26 = vld [vmem:[%s2464_s27 + $0x128] sm:$0xff]  ;;  %v430_v27 = vld [vmem:[%s2464_s27 + $0x138] sm:$0xff]  ;;  %s375_s13 = scalar_lea.vmem %s3147_s3, %s1906_s17  ;;  %s1937_s15 = sshll.u32 %s682_s12, 5 }
  0x5a   : > { %483 = vmatprep.subr.mxu0 %v440_v14  ;;  %572 = vmatprep.subr.mxu1 %v442_v15  ;;  %v427_v28 = vld [vmem:[%s2464_s27 + $0x120] sm:$0xff]  ;;  %v429_v29 = vld [vmem:[%s2464_s27 + $0x130] sm:$0xff]  ;;  %v424_v30 = vld [vmem:[%s2464_s27 + $0x108] sm:$0xff]  ;;  %s686_s22 = scalar_lea.vmem [#allocation4], %s1937_s15  ;;  %s1913_s9 = sshll.u32 %s2787_s29, 3 }
  0x5b   : > { %484 = vmatpush1.msra.mxu0 %v439_v16  ;;  %573 = vmatpush1.msra.mxu1 %v441_v17  ;;  %v426_v31 = vld [vmem:[%s2464_s27 + $0x118] sm:$0xff]  ;;  %v423_v32 = vld [vmem:[%s2464_s27 + $0x100] sm:$0xff]  ;;  %v425_v33 = vld [vmem:[%s2464_s27 + $0x110] sm:$0xff]  ;;  %s2985_s30 = scalar_select %p679_p8, 2, 1 }
  0x5c   : > { %485 = vmatprep.subr.mxu0 %v436_v18  ;;  %574 = vmatprep.subr.mxu1 %v438_v19  ;;  %v420_v34 = vld [vmem:[%s2464_s27 + $0xe8] sm:$0xff]  ;;  %v422_v35 = vld [vmem:[%s2464_s27 + $0xf8] sm:$0xff]  ;;  %v419_v36 = vld [vmem:[%s2464_s27 + $0xe0] sm:$0xff]  ;;  %s940_s28 = sshra.s32 %s1913_s9, 3  ;;  %s1192_s10 = scalar_lea.vmem %s2907_s26, %s1913_s9 [#allocation11] }
  0x5d   : > { %486 = vmatpush1.msra.mxu0 %v435_v20  ;;  %575 = vmatpush1.msra.mxu1 %v437_v21  ;;  %v421_v37 = vld [vmem:[%s2464_s27 + $0xf0] sm:$0xff]  ;;  %v416_v38 = vld [vmem:[%s2464_s27 + $0xc8] sm:$0xff]  ;;  %v418_v39 = vld [vmem:[%s2464_s27 + $0xd8] sm:$0xff]  ;;  %s1938_s17 = sshll.u32 %s940_s28, 5  ;;  %s1734_s9 = sshll.u32 %s2907_s26, 4  ;;  %s3096_s9 = int_to_ptr.vmem [resolvable:$true] %s1734_s9 }
  0x5e   : > { %487 = vmatprep.subr.mxu0 %v432_v22  ;;  %576 = vmatprep.subr.mxu1 %v434_v23  ;;  %v415_v40 = vld [vmem:[%s2464_s27 + $0xc0] sm:$0xff]  ;;  %v417_v41 = vld [vmem:[%s2464_s27 + $0xd0] sm:$0xff]  ;;  %v412_v42 = vld [vmem:[%s2464_s27 + $0xa8] sm:$0xff]  ;;  %s944_s16 = scalar_lea.vmem [#allocation4], %s1938_s17 }
  0x5f   : > { %488 = vmatpush1.msra.mxu0 %v431_v24  ;;  %577 = vmatpush1.msra.mxu1 %v433_v25  ;;  %v414_v43 = vld [vmem:[%s2464_s27 + $0xb8] sm:$0xff]  ;;  %v411_v44 = vld [vmem:[%s2464_s27 + $0xa0] sm:$0xff]  ;;  %v413_v45 = vld [vmem:[%s2464_s27 + $0xb0] sm:$0xff] }
  0x60   : > { %489 = vmatprep.subr.mxu0 %v428_v26  ;;  %578 = vmatprep.subr.mxu1 %v430_v27  ;;  %v408_v46 = vld [vmem:[%s2464_s27 + $0x88] sm:$0xff]  ;;  %v410_v47 = vld [vmem:[%s2464_s27 + $0x98] sm:$0xff]  ;;  %v407_v48 = vld [vmem:[%s2464_s27 + $0x80] sm:$0xff] }
  0x61   : > { %490 = vmatpush1.msra.mxu0 %v427_v28  ;;  %579 = vmatpush1.msra.mxu1 %v429_v29  ;;  %v409_v49 = vld [vmem:[%s2464_s27 + $0x90] sm:$0xff]  ;;  %v404_v50 = vld [vmem:[%s2464_s27 + $0x68] sm:$0xff]  ;;  %v406_v51 = vld [vmem:[%s2464_s27 + $0x78] sm:$0xff] }
  0x62   : > { %491 = vmatprep.subr.mxu0 %v424_v30  ;;  %580 = vmatprep.subr.mxu1 %v426_v31  ;;  %v403_v52 = vld [vmem:[%s2464_s27 + $0x60] sm:$0xff]  ;;  %v405_v53 = vld [vmem:[%s2464_s27 + $0x70] sm:$0xff]  ;;  %v400_v54 = vld [vmem:[%s2464_s27 + $0x48] sm:$0xff] }
  0x63   : > { %492 = vmatpush1.msra.mxu0 %v423_v32  ;;  %581 = vmatpush1.msra.mxu1 %v425_v33  ;;  %v402_v55 = vld [vmem:[%s2464_s27 + $0x58] sm:$0xff]  ;;  %v399_v56 = vld [vmem:[%s2464_s27 + $0x40] sm:$0xff]  ;;  %v401_v57 = vld [vmem:[%s2464_s27 + $0x50] sm:$0xff] }
  0x64   : > { %493 = vmatprep.subr.mxu0 %v420_v34  ;;  %582 = vmatprep.subr.mxu1 %v422_v35  ;;  %v396_v58 = vld [vmem:[%s2464_s27 + $0x28] sm:$0xff]  ;;  %v398_v59 = vld [vmem:[%s2464_s27 + $0x38] sm:$0xff]  ;;  %v395_v60 = vld [vmem:[%s2464_s27 + $0x20] sm:$0xff] }
  0x65   : > { %494 = vmatpush1.msra.mxu0 %v419_v36  ;;  %583 = vmatpush1.msra.mxu1 %v421_v37  ;;  %v397_v61 = vld [vmem:[%s2464_s27 + $0x30] sm:$0xff]  ;;  %v392_v62 = vld [vmem:[%s2464_s27 + $0x8] sm:$0xff]  ;;  %v394_v63 = vld [vmem:[%s2464_s27 + $0x18] sm:$0xff] }
  0x66   : > { %495 = vmatprep.subr.mxu0 %v416_v38  ;;  %584 = vmatprep.subr.mxu1 %v418_v39  ;;  %v391_v2 = vld [vmem:[%s2464_s27] sm:$0xff]  ;;  %v393_v3 = vld [vmem:[%s2464_s27 + $0x10] sm:$0xff]  ;;  %v2543_v5 = vld [vmem:[%s2540_s2 + $0x1e8] sm:$0xff]  ;;  %s934_s27 = scalar_lea.vmem %s2907_s26, %s1907_s11 [#allocation11] }
  0x67   : > { %496 = vmatpush1.msra.mxu0 %v415_v40  ;;  %585 = vmatpush1.msra.mxu1 %v417_v41  ;;  %v387_v4 = vld [vmem:[#allocation5] sm:$0xff]  ;;  %v2546_v6 = vld [vmem:[%s2540_s2 + $0x1f8] sm:$0xff]  ;;  %v2552_v8 = vld [vmem:[%s2540_s2 + $0x1f0] sm:$0xff] }
  0x68   : > { %497 = vmatprep.subr.mxu0 %v412_v42  ;;  %586 = vmatprep.subr.mxu1 %v414_v43  ;;  %v2549_v7 = vld [vmem:[%s2540_s2 + $0x1e0] sm:$0xff]  ;;  %v2556_v9 = vld [vmem:[%s2540_s2 + $0x1c8] sm:$0xff]  ;;  %v2559_v10 = vld [vmem:[%s2540_s2 + $0x1d8] sm:$0xff] }
  0x69   : > { %498 = vmatpush1.msra.mxu0 %v411_v44  ;;  %587 = vmatpush1.msra.mxu1 %v413_v45  ;;  %v2563_v11 = vld [vmem:[%s2540_s2 + $0x1c0] sm:$0xff]  ;;  %v2568_v12 = vld [vmem:[%s2540_s2 + $0x1d0] sm:$0xff]  ;;  %v388_v13 = vld [vmem:[#allocation5 + $0x8] sm:$0xff] }
  0x6a   : > { %499 = vmatprep.subr.mxu0 %v408_v46  ;;  %588 = vmatprep.subr.mxu1 %v410_v47  ;;  %v2573_v14 = vld [vmem:[%s2540_s2 + $0x1a8] sm:$0xff]  ;;  %v2576_v15 = vld [vmem:[%s2540_s2 + $0x1b8] sm:$0xff]  ;;  %v2581_v16 = vld [vmem:[%s2540_s2 + $0x1a0] sm:$0xff] }
  0x6b   : > { %500 = vmatpush1.msra.mxu0 %v407_v48  ;;  %589 = vmatpush1.msra.mxu1 %v409_v49  ;;  %v2584_v17 = vld [vmem:[%s2540_s2 + $0x1b0] sm:$0xff]  ;;  %v2588_v18 = vld [vmem:[%s2540_s2 + $0x188] sm:$0xff]  ;;  %v2591_v19 = vld [vmem:[%s2540_s2 + $0x198] sm:$0xff] }
  0x6c   : > { %501 = vmatprep.subr.mxu0 %v404_v50  ;;  %590 = vmatprep.subr.mxu1 %v406_v51  ;;  %v2596_v20 = vld [vmem:[%s2540_s2 + $0x180] sm:$0xff]  ;;  %v2601_v21 = vld [vmem:[%s2540_s2 + $0x190] sm:$0xff]  ;;  %v2606_v23 = vld [vmem:[%s2540_s2 + $0x168] sm:$0xff] }
  0x6d   : > { %502 = vmatpush1.msra.mxu0 %v403_v52  ;;  %591 = vmatpush1.msra.mxu1 %v405_v53  ;;  %v389_v22 = vld [vmem:[#allocation5 + $0x10] sm:$0xff]  ;;  %v2611_v24 = vld [vmem:[%s2540_s2 + $0x178] sm:$0xff]  ;;  %v2615_v25 = vld [vmem:[%s2540_s2 + $0x160] sm:$0xff] }
  0x6e   : > { %503 = vmatprep.subr.mxu0 %v400_v54  ;;  %592 = vmatprep.subr.mxu1 %v402_v55  ;;  %v2618_v26 = vld [vmem:[%s2540_s2 + $0x170] sm:$0xff]  ;;  %v2623_v27 = vld [vmem:[%s2540_s2 + $0x148] sm:$0xff]  ;;  %v2626_v28 = vld [vmem:[%s2540_s2 + $0x158] sm:$0xff] }
  0x6f   : > { %504 = vmatpush1.msra.mxu0 %v399_v56  ;;  %593 = vmatpush1.msra.mxu1 %v401_v57  ;;  %v2630_v29 = vld [vmem:[%s2540_s2 + $0x140] sm:$0xff]  ;;  %v2635_v30 = vld [vmem:[%s2540_s2 + $0x150] sm:$0xff]  ;;  %v390_v31 = vld [vmem:[#allocation5 + $0x18] sm:$0xff] }
  0x70   : > { %505 = vmatprep.subr.mxu0 %v396_v58  ;;  %594 = vmatprep.subr.mxu1 %v398_v59  ;;  %v2640_v32 = vld [vmem:[%s2540_s2 + $0x128] sm:$0xff]  ;;  %v2645_v33 = vld [vmem:[%s2540_s2 + $0x138] sm:$0xff]  ;;  %v2649_v34 = vld [vmem:[%s2540_s2 + $0x120] sm:$0xff] }
  0x71   : > { %506 = vmatpush1.msra.mxu0 %v395_v60  ;;  %595 = vmatpush1.msra.mxu1 %v397_v61  ;;  %v2652_v35 = vld [vmem:[%s2540_s2 + $0x130] sm:$0xff]  ;;  %v2657_v36 = vld [vmem:[%s2540_s2 + $0x108] sm:$0xff]  ;;  %v2660_v37 = vld [vmem:[%s2540_s2 + $0x118] sm:$0xff] }
  0x72   : > { %507 = vmatprep.subr.mxu0 %v392_v62  ;;  %596 = vmatprep.subr.mxu1 %v394_v63  ;;  %v2664_v38 = vld [vmem:[%s2540_s2 + $0x100] sm:$0xff]  ;;  %v2667_v39 = vld [vmem:[%s2540_s2 + $0x110] sm:$0xff]  ;;  %v2672_v40 = vld [vmem:[%s2540_s2 + $0xe8] sm:$0xff] }
  0x73   : > { %508 = vmatpush1.msra.mxu0 %v391_v2  ;;  %597 = vmatpush1.msra.mxu1 %v393_v3  ;;  %v2677_v41 = vld [vmem:[%s2540_s2 + $0xf8] sm:$0xff]  ;;  %v2682_v42 = vld [vmem:[%s2540_s2 + $0xe0] sm:$0xff]  ;;  %v2685_v43 = vld [vmem:[%s2540_s2 + $0xf0] sm:$0xff] }
  0x74   : > { %542 = vmatmul.mubr.f32.vlgmr.msra.gmra.mxu0 %v387_v4  ;;  %755 = vmatprep.subr.mxu0 %v2543_v5  ;;  %v2690_v44 = vld [vmem:[%s2540_s2 + $0xc8] sm:$0xff]  ;;  %v2693_v45 = vld [vmem:[%s2540_s2 + $0xd8] sm:$0xff]  ;;  %v2697_v46 = vld [vmem:[%s2540_s2 + $0xc0] sm:$0xff] }
  0x75   : > { %826 = vmatprep.subr.mxu1 %v2546_v6  ;;  %631 = vmatmul.mubr.f32.vlgmr.msra.gmra.mxu1 %v387_v4  ;;  %v2700_v47 = vld [vmem:[%s2540_s2 + $0xd0] sm:$0xff]  ;;  %v2705_v48 = vld [vmem:[%s2540_s2 + $0xa8] sm:$0xff]  ;;  %v2708_v49 = vld [vmem:[%s2540_s2 + $0xb8] sm:$0xff] }
  0x76   : > { %756 = vmatpush1.msra.mxu0 %v2549_v7  ;;  %827 = vmatpush1.msra.mxu1 %v2552_v8  ;;  %v2714_v50 = vld [vmem:[%s2540_s2 + $0xa0] sm:$0xff]  ;;  %v2717_v51 = vld [vmem:[%s2540_s2 + $0xb0] sm:$0xff]  ;;  %v2722_v52 = vld [vmem:[%s2540_s2 + $0x88] sm:$0xff] }
  0x77   : > { %757 = vmatprep.subr.mxu0 %v2556_v9  ;;  %828 = vmatprep.subr.mxu1 %v2559_v10  ;;  %v2725_v53 = vld [vmem:[%s2540_s2 + $0x98] sm:$0xff]  ;;  %v2730_v54 = vld [vmem:[%s2540_s2 + $0x80] sm:$0xff]  ;;  %v2733_v55 = vld [vmem:[%s2540_s2 + $0x90] sm:$0xff] }
  0x78   : > { %547 = vmatprep.mubr.f32.mxu0 %v3158_v0  ;;  %758 = vmatpush1.msra.mxu0 %v2563_v11  ;;  %3204 = vst [vmem:[#allocation17_spill] sm:$0xff] %v2725_v53  ;;  %3205 = vst [vmem:[#allocation18_spill] sm:$0xff] %v2730_v54  ;;  %v2738_v56 = vld [vmem:[%s2540_s2 + $0x68] sm:$0xff]  ;;  %v2741_v57 = vld [vmem:[%s2540_s2 + $0x78] sm:$0xff] }
  0x79   : > { %829 = vmatpush1.msra.mxu1 %v2568_v12  ;;  %548 = vmatmul.mubr.f32.gmra.mxu0 %v388_v13  ;;  %3206 = vst [vmem:[#allocation19_spill] sm:$0xff] %v2733_v55  ;;  %3207 = vst [vmem:[#allocation20_spill] sm:$0xff] %v2738_v56  ;;  %v2750_v58 = vld [vmem:[%s2540_s2 + $0x60] sm:$0xff]  ;;  %v2753_v59 = vld [vmem:[%s2540_s2 + $0x70] sm:$0xff] }
  0x7a   : > { %759 = vmatprep.subr.mxu0 %v2573_v14  ;;  %830 = vmatprep.subr.mxu1 %v2576_v15  ;;  %3208 = vst [vmem:[#allocation21_spill] sm:$0xff] %v2741_v57  ;;  %3209 = vst [vmem:[#allocation22_spill] sm:$0xff] %v2750_v58  ;;  %v2758_v60 = vld [vmem:[%s2540_s2 + $0x48] sm:$0xff]  ;;  %v2761_v61 = vld [vmem:[%s2540_s2 + $0x58] sm:$0xff] }
  0x7b   : > { %760 = vmatpush1.msra.mxu0 %v2581_v16  ;;  %831 = vmatpush1.msra.mxu1 %v2584_v17  ;;  %3210 = vst [vmem:[#allocation23_spill] sm:$0xff] %v2753_v59  ;;  %3211 = vst [vmem:[#allocation24_spill] sm:$0xff] %v2758_v60  ;;  %v2766_v62 = vld [vmem:[%s2540_s2 + $0x40] sm:$0xff]  ;;  %v2769_v63 = vld [vmem:[%s2540_s2 + $0x50] sm:$0xff] }
  0x7c   : > { %761 = vmatprep.subr.mxu0 %v2588_v18  ;;  %832 = vmatprep.subr.mxu1 %v2591_v19  ;;  %3212 = vst [vmem:[#allocation25_spill] sm:$0xff] %v2761_v61  ;;  %3213 = vst [vmem:[#allocation26_spill] sm:$0xff] %v2766_v62  ;;  %v2774_v2 = vld [vmem:[%s2540_s2 + $0x28] sm:$0xff]  ;;  %v2777_v3 = vld [vmem:[%s2540_s2 + $0x38] sm:$0xff] }
  0x7d   : > { %553 = vmatprep.mubr.f32.mxu0 %v3158_v0  ;;  %762 = vmatpush1.msra.mxu0 %v2596_v20  ;;  %3214 = vst [vmem:[#allocation27_spill] sm:$0xff] %v2769_v63  ;;  %3215 = vst [vmem:[#allocation28_spill] sm:$0xff] %v2774_v2  ;;  %v2782_v4 = vld [vmem:[%s3144_s0] sm:$0xff]  ;;  %v2800_v1 = vld [vmem:[%s2540_s2 + $0x8] sm:$0xff] }
  0x7e   : > { %833 = vmatpush1.msra.mxu1 %v2601_v21  ;;  %554 = vmatmul.mubr.f32.gmra.mxu0 %v389_v22  ;;  %3216 = vst [vmem:[#allocation29_spill] sm:$0xff] %v2777_v3  ;;  %3217 = vst [vmem:[#allocation30_spill] sm:$0xff] %v2782_v4 }
  0x7f   : > { %636 = vmatprep.mubr.f32.mxu1 %v3158_v0  ;;  %763 = vmatprep.subr.mxu0 %v2606_v23  ;;  %3220 = vst [vmem:[#allocation33_spill] sm:$0xff] %v2800_v1 }
  0x80   : > { %834 = vmatprep.subr.mxu1 %v2611_v24  ;;  %637 = vmatmul.mubr.f32.gmra.mxu1 %v388_v13  ;;  %v926_v13 = vstv %s2745_s24  ;;  %s2981_s24 = scalar_select %p679_p8, 3, 0 }
  0x81   : > { %764 = vmatpush1.msra.mxu0 %v2615_v25  ;;  %835 = vmatpush1.msra.mxu1 %v2618_v26  ;;  %vm927_vm0 = vcmp.lt.s32.totalorder %v926_v13, %v2782_v4 }
  0x82   : > { %765 = vmatprep.subr.mxu0 %v2623_v27  ;;  %836 = vmatprep.subr.mxu1 %v2626_v28  ;;  %s1925_s15 = sshll.u32 %s2981_s24, 3 }
  0x83   : > { %559 = vmatprep.mubr.f32.mxu0 %v3158_v0  ;;  %766 = vmatpush1.msra.mxu0 %v2630_v29  ;;  %s1708_s28 = scalar_lea.vmem %s2907_s26, %s1925_s15 [#allocation11] }
  0x84   : > { %837 = vmatpush1.msra.mxu1 %v2635_v30  ;;  %560 = vmatmul.mubr.f32.gmra.mxu0 %v390_v31 }
  0x85   : > { %642 = vmatprep.mubr.f32.mxu1 %v3158_v0  ;;  %767 = vmatprep.subr.mxu0 %v2640_v32 }
  0x86   : > { %838 = vmatprep.subr.mxu1 %v2645_v33  ;;  %643 = vmatmul.mubr.f32.gmra.mxu1 %v389_v22  ;;  %v2792_v22 = vld [vmem:[%s2540_s2 + $0x20] sm:$0xff] }
  0x87   : > { %768 = vmatpush1.msra.mxu0 %v2649_v34  ;;  %839 = vmatpush1.msra.mxu1 %v2652_v35  ;;  %3218 = vst [vmem:[#allocation31_spill] sm:$0xff] %v2792_v22 }
  0x88   : > { %769 = vmatprep.subr.mxu0 %v2657_v36  ;;  %840 = vmatprep.subr.mxu1 %v2660_v37 }
  0x89   : > { %770 = vmatpush1.msra.mxu0 %v2664_v38  ;;  %841 = vmatpush1.msra.mxu1 %v2667_v39 }
  0x8a   : > { %648 = vmatprep.mubr.f32.mxu1 %v3158_v0  ;;  %771 = vmatprep.subr.mxu0 %v2672_v40  ;;  %v2803_v0 = vld [vmem:[%s2540_s2 + $0x18] sm:$0xff] }
  0x8b   : > { %842 = vmatprep.subr.mxu1 %v2677_v41  ;;  %649 = vmatmul.mubr.f32.gmra.mxu1 %v390_v31  ;;  %v2795_v31 = vld [vmem:[%s2540_s2 + $0x30] sm:$0xff]  ;;  %3221 = vst [vmem:[#allocation34_spill] sm:$0xff] %v2803_v0 }
  0x8c   : > { %772 = vmatpush1.msra.mxu0 %v2682_v42  ;;  %843 = vmatpush1.msra.mxu1 %v2685_v43  ;;  %3219 = vst [vmem:[#allocation32_spill] sm:$0xff] %v2795_v31 }
  0x8d   : > { %773 = vmatprep.subr.mxu0 %v2690_v44  ;;  %844 = vmatprep.subr.mxu1 %v2693_v45 }
  0x8e   : > { %774 = vmatpush1.msra.mxu0 %v2697_v46  ;;  %845 = vmatpush1.msra.mxu1 %v2700_v47 }
  0x8f   : > { %775 = vmatprep.subr.mxu0 %v2705_v48  ;;  %846 = vmatprep.subr.mxu1 %v2708_v49 }
  0x90   : > { %776 = vmatpush1.msra.mxu0 %v2714_v50  ;;  %847 = vmatpush1.msra.mxu1 %v2717_v51 }
  0x91   : > { %777 = vmatprep.subr.mxu0 %v2722_v52  ;;  %848 = vmatprep.subr.mxu1 %v2725_v53 }
  0x92   : > { %778 = vmatpush1.msra.mxu0 %v2730_v54  ;;  %849 = vmatpush1.msra.mxu1 %v2733_v55 }
  0x93   : > { %779 = vmatprep.subr.mxu0 %v2738_v56  ;;  %850 = vmatprep.subr.mxu1 %v2741_v57 }
  0x94   : > { %780 = vmatpush1.msra.mxu0 %v2750_v58  ;;  %851 = vmatpush1.msra.mxu1 %v2753_v59  ;;  %v2808_v59 = vld [vmem:[%s2540_s2] sm:$0xff] }
  0x95   : > { %781 = vmatprep.subr.mxu0 %v2758_v60  ;;  %852 = vmatprep.subr.mxu1 %v2761_v61  ;;  %3222 = vst [vmem:[#allocation35_spill] sm:$0xff] %v2808_v59  ;;  %v2814_v61 = vld [vmem:[%s2540_s2 + $0x10] sm:$0xff] }
  0x96   : > { %782 = vmatpush1.msra.mxu0 %v2766_v62  ;;  %853 = vmatpush1.msra.mxu1 %v2769_v63  ;;  %3223 = vst [vmem:[#allocation36_spill] sm:$0xff] %v2814_v61  ;;  %v1184_v62 = vstv %s2787_s29  ;;  %s1919_s29 = sshll.u32 %s2985_s30, 3 }
  0x97   : > { %783 = vmatprep.subr.mxu0 %v2774_v2  ;;  %854 = vmatprep.subr.mxu1 %v2777_v3  ;;  %v3224_v2 = vmov 0.0   ;;  %v3225_v3 = vmov 0   ;;  %vm1185_vm1 = vcmp.lt.s32.totalorder %v1184_v62, %v2782_v4  ;;  %v3226_v62 = vld [vmem:[#allocation23_spill] sm:$0xff]  ;;  %v3230_v4 = vld [vmem:[#allocation28_spill] sm:$0xff] }
  0x98   : > { %784 = vmatpush1.msra.mxu0 %v2792_v22  ;;  %855 = vmatpush1.msra.mxu1 %v2795_v31  ;;  %v928_v63 = vsel %vm927_vm0, 1, %v3225_v3  ;;  %v1186_v13 = vsel %vm1185_vm1, 1, %v3225_v3  ;;  %v3229_v3 = vld [vmem:[#allocation27_spill] sm:$0xff] }
  0x99   : > { %785 = vmatprep.subr.mxu0 %v2800_v1  ;;  %856 = vmatprep.subr.mxu1 %v2803_v0 }
  0x9a   : > { %786 = vmatpush1.msra.mxu0 %v2808_v59  ;;  %819 = vmatprep.mubr.f32.mxu0 %v3224_v2 }
  0x9b   : > { %857 = vmatpush1.msra.mxu1 %v2814_v61  ;;  %890 = vmatprep.mubr.f32.mxu1 %v3224_v2 }
  0x9c   : > { %820 = vmatmul.mubr.f32.vlgmr.msra.gmra.mxu0 %v3224_v2  ;;  %891 = vmatmul.mubr.f32.vlgmr.msra.gmra.mxu1 %v3224_v2 }
  0x9d   : > { %930 = vperm.xlu0 %2029, %v928_v63   ;;  %1013 = vmatprep.subr.mxu0 %v2543_v5  ;;  %v3227_v63 = vld [vmem:[#allocation25_spill] sm:$0xff] }
  0x9e   : > { %1084 = vmatprep.subr.mxu1 %v2546_v6  ;;  %1014 = vmatpush1.msra.mxu0 %v2549_v7 }
  0x9f   : > { %1085 = vmatpush1.msra.mxu1 %v2552_v8  ;;  %1015 = vmatprep.subr.mxu0 %v2556_v9 }
  0xa0   : > { %1086 = vmatprep.subr.mxu1 %v2559_v10  ;;  %1016 = vmatpush1.msra.mxu0 %v2563_v11 }
  0xa1   : > { %1188 = vperm.xlu0 %2029, %v1186_v13   ;;  %1087 = vmatpush1.msra.mxu1 %v2568_v12  ;;  %v3228_v13 = vld [vmem:[#allocation26_spill] sm:$0xff] }
  0xa2   : > { %1017 = vmatprep.subr.mxu0 %v2573_v14  ;;  %1088 = vmatprep.subr.mxu1 %v2576_v15 }
  0xa3   : > { %1018 = vmatpush1.msra.mxu0 %v2581_v16  ;;  %1089 = vmatpush1.msra.mxu1 %v2584_v17 }
  0xa4   : > { %1019 = vmatprep.subr.mxu0 %v2588_v18  ;;  %1090 = vmatprep.subr.mxu1 %v2591_v19 }
  0xa5   : > { %1020 = vmatpush1.msra.mxu0 %v2596_v20  ;;  %1091 = vmatpush1.msra.mxu1 %v2601_v21 }
  0xa6   : > { %1021 = vmatprep.subr.mxu0 %v2606_v23  ;;  %1092 = vmatprep.subr.mxu1 %v2611_v24 }
  0xa7   : > { %1022 = vmatpush1.msra.mxu0 %v2615_v25  ;;  %1093 = vmatpush1.msra.mxu1 %v2618_v26 }
  0xa8   : > { %1023 = vmatprep.subr.mxu0 %v2623_v27  ;;  %1094 = vmatprep.subr.mxu1 %v2626_v28 }
  0xa9   : > { %1024 = vmatpush1.msra.mxu0 %v2630_v29  ;;  %1095 = vmatpush1.msra.mxu1 %v2635_v30 }
  0xaa   : > { %1025 = vmatprep.subr.mxu0 %v2640_v32  ;;  %1096 = vmatprep.subr.mxu1 %v2645_v33 }
  0xab   : > { %1026 = vmatpush1.msra.mxu0 %v2649_v34  ;;  %1097 = vmatpush1.msra.mxu1 %v2652_v35 }
  0xac   : > { %1027 = vmatprep.subr.mxu0 %v2657_v36  ;;  %1098 = vmatprep.subr.mxu1 %v2660_v37 }
  0xad   : > { %1028 = vmatpush1.msra.mxu0 %v2664_v38  ;;  %1099 = vmatpush1.msra.mxu1 %v2667_v39 }
  0xae   : > { %1029 = vmatprep.subr.mxu0 %v2672_v40  ;;  %1100 = vmatprep.subr.mxu1 %v2677_v41 }
  0xaf   : > { %1030 = vmatpush1.msra.mxu0 %v2682_v42  ;;  %1101 = vmatpush1.msra.mxu1 %v2685_v43 }
  0xb0   : > { %1031 = vmatprep.subr.mxu0 %v2690_v44  ;;  %1102 = vmatprep.subr.mxu1 %v2693_v45 }
  0xb1   : > { %1032 = vmatpush1.msra.mxu0 %v2697_v46  ;;  %1103 = vmatpush1.msra.mxu1 %v2700_v47 }
  0xb2   : > { %1033 = vmatprep.subr.mxu0 %v2705_v48  ;;  %1104 = vmatprep.subr.mxu1 %v2708_v49 }
  0xb3   : > { %1034 = vmatpush1.msra.mxu0 %v2714_v50  ;;  %1105 = vmatpush1.msra.mxu1 %v2717_v51 }
  0xb4   : > { %1035 = vmatprep.subr.mxu0 %v2722_v52  ;;  %1106 = vmatprep.subr.mxu1 %v2725_v53 }
  0xb5   : > { %1036 = vmatpush1.msra.mxu0 %v2730_v54  ;;  %1107 = vmatpush1.msra.mxu1 %v2733_v55  ;;  %v3231_v55 = vld [vmem:[#allocation29_spill] sm:$0xff] }
  0xb6   : > { %1037 = vmatprep.subr.mxu0 %v2738_v56  ;;  %1108 = vmatprep.subr.mxu1 %v2741_v57 }
  0xb7   : > { %1038 = vmatpush1.msra.mxu0 %v2750_v58  ;;  %1109 = vmatpush1.msra.mxu1 %v3226_v62 }
  0xb8   : > { %1039 = vmatprep.subr.mxu0 %v2758_v60  ;;  %1110 = vmatprep.subr.mxu1 %v3227_v63 }
  0xb9   : > { %1040 = vmatpush1.msra.mxu0 %v3228_v13  ;;  %1111 = vmatpush1.msra.mxu1 %v3229_v3 }
  0xba   : > { %1041 = vmatprep.subr.mxu0 %v3230_v4  ;;  %1112 = vmatprep.subr.mxu1 %v3231_v55 }
  0xbb   : > { %1042 = vmatpush1.msra.mxu0 %v2792_v22  ;;  %1113 = vmatpush1.msra.mxu1 %v2795_v31  ;;  %v457_v22 = vlaneseq }
  0xbc   : > { %1043 = vmatprep.subr.mxu0 %v2800_v1  ;;  %1114 = vmatprep.subr.mxu1 %v2803_v0  ;;  %v455_v0 = vld [vmem:[%s375_s13] sm:$0xf]  ;;  %s1198_s13 = sshra.s32 %s1919_s29, 3 }
  0xbd   : > { %1044 = vmatpush1.msra.mxu0 %v2808_v59  ;;  %1077 = vmatprep.mubr.f32.mxu0 %v3224_v2  ;;  %v458_v31 = vshrl.u32 %v457_v22, 7  ;;  %s1939_s11 = sshll.u32 %s1198_s13, 5 }
  0xbe   : > { %1115 = vmatpush1.msra.mxu1 %v2814_v61  ;;  %1148 = vmatprep.mubr.f32.mxu1 %v3224_v2  ;;  %s1202_s12 = scalar_lea.vmem [#allocation4], %s1939_s11 }
  0xbf   : > { %1271 = vmatprep.subr.mxu0 %v2543_v5  ;;  %1342 = vmatprep.subr.mxu1 %v2546_v6  ;;  %v459_v59 = vsub.s32 0, %v458_v31  ;;  %v467_v1 = vsub.s32 2, %v458_v31  ;;  %v463_v55 = vsub.s32 1, %v458_v31  ;;  %v471_v61 = vsub.s32 3, %v458_v31 }
  0xc1   : > { %v460_v4 = vrot.slane %v455_v0, %v459_v59  ;;  %v468_v2 = vrot.slane %v455_v0, %v467_v1  ;;  %v464_v3 = vrot.slane %v455_v0, %v463_v55  ;;  %v472_v13 = vrot.slane %v455_v0, %v471_v61 }
 0x134   : > { %v543_v5 = vpop.f32.mrf.mxu0 }
 0x135   : > { %v544_v6 = vadd.f32 %v543_v5, %v460_v4  ;;  %v632_v63 = vpop.f32.mrf.mxu1 }
 0x136   : > { %v545_v60 = vpop.f32.mrf.mxu0  ;;  %v633_v62 = vadd.f32 %v632_v63, %v468_v2 }
 0x137   : > { %655 = vst [vmem:[#allocation4] sm:$0xff] %v544_v6  ;;  %v546_v22 = vadd.f32 %v545_v60, %v464_v3  ;;  %v634_v58 = vpop.f32.mrf.mxu1 }
 0x138   : > { %657 = vst [vmem:[#allocation4 + $0x10] sm:$0xff] %v633_v62  ;;  %v635_v57 = vadd.f32 %v634_v58, %v472_v13 }
 0x139   : > { %656 = vst [vmem:[#allocation4 + $0x8] sm:$0xff] %v546_v22  ;;  %v549_v56 = vpop.f32.mrf.mxu0 }
 0x13a   : > { %v550_v54 = vadd.f32 %v549_v56, %v460_v4  ;;  %658 = vst [vmem:[#allocation4 + $0x18] sm:$0xff] %v635_v57 }
 0x13b   : > { %v551_v53 = vpop.f32.mrf.mxu0 }
 0x13c   : > { %659 = vst [vmem:[#allocation4 + $0x20] sm:$0xff] %v550_v54  ;;  %v552_v59 = vadd.f32 %v551_v53, %v464_v3 }
 0x13e   : > { %660 = vst [vmem:[#allocation4 + $0x28] sm:$0xff] %v552_v59  ;;  %v555_v1 = vpop.f32.mrf.mxu0 }
 0x13f   : > { %v556_v55 = vadd.f32 %v555_v1, %v460_v4 }
 0x140   : > { %v638_v0 = vpop.f32.mrf.mxu1  ;;  %v557_v61 = vpop.f32.mrf.mxu0 }
 0x141   : > { %663 = vst [vmem:[#allocation4 + $0x40] sm:$0xff] %v556_v55  ;;  %v639_v31 = vadd.f32 %v638_v0, %v468_v2  ;;  %v558_v63 = vadd.f32 %v557_v61, %v464_v3 }
 0x142   : > { %v640_v5 = vpop.f32.mrf.mxu1 }
 0x143   : > { %661 = vst [vmem:[#allocation4 + $0x30] sm:$0xff] %v639_v31  ;;  %664 = vst [vmem:[#allocation4 + $0x48] sm:$0xff] %v558_v63  ;;  %v641_v60 = vadd.f32 %v640_v5, %v472_v13 }
 0x144   : > { %v561_v58 = vpop.f32.mrf.mxu0 }
 0x145   : > { %662 = vst [vmem:[#allocation4 + $0x38] sm:$0xff] %v641_v60  ;;  %v562_v62 = vadd.f32 %v561_v58, %v460_v4 }
 0x146   : > { %v644_v56 = vpop.f32.mrf.mxu1  ;;  %v563_v57 = vpop.f32.mrf.mxu0 }
 0x147   : > { %667 = vst [vmem:[#allocation4 + $0x60] sm:$0xff] %v562_v62  ;;  %v645_v53 = vadd.f32 %v644_v56, %v468_v2  ;;  %v564_v54 = vadd.f32 %v563_v57, %v464_v3 }
 0x148   : > { %v646_v6 = vpop.f32.mrf.mxu1 }
 0x149   : > { %665 = vst [vmem:[#allocation4 + $0x50] sm:$0xff] %v645_v53  ;;  %668 = vst [vmem:[#allocation4 + $0x68] sm:$0xff] %v564_v54  ;;  %v647_v22 = vadd.f32 %v646_v6, %v472_v13 }
 0x14b   : > { %666 = vst [vmem:[#allocation4 + $0x58] sm:$0xff] %v647_v22  ;;  %v650_v59 = vpop.f32.mrf.mxu1 }
 0x14c   : > { %v651_v1 = vadd.f32 %v650_v59, %v468_v2 }
 0x14d   : > { %v652_v55 = vpop.f32.mrf.mxu1 }
 0x14e   : > { %669 = vst [vmem:[#allocation4 + $0x70] sm:$0xff] %v651_v1  ;;  %v653_v0 = vadd.f32 %v652_v55, %v472_v13 }
 0x150   : > { %670 = vst [vmem:[#allocation4 + $0x78] sm:$0xff] %v653_v0 }
 0x157   : > { %v687_v4 = vld [vmem:[%s686_s22] sm:$0xff]  ;;  %v688_v3 = vld [vmem:[%s686_s22 + $0x8] sm:$0xff]  ;;  %v690_v56 = vld [vmem:[%s686_s22 + $0x18] sm:$0xff] }
 0x158   : > { %v689_v53 = vld [vmem:[%s686_s22 + $0x10] sm:$0xff]  ;;  %s1456_s22 = sshra.s32 %s1925_s15, 3 }
 0x159   : > { %s1940_s14 = sshll.u32 %s1456_s22, 5 }
 0x15c   : > { %v821_v61 = vpop.f32.mrf.mxu0  ;;  %v892_v58 = vpop.f32.mrf.mxu1 }
 0x15d   : > { %v897_v31 = vadd.f32 %v821_v61, %v687_v4  ;;  %v899_v6 = vadd.f32 %v892_v58, %v689_v53  ;;  %v931_v61 = vpop.permute.xlu0 %930 }
 0x15e   : > { %v823_v63 = vpop.f32.mrf.mxu0  ;;  %v894_v2 = vpop.f32.mrf.mxu1  ;;  %vm932_vm2 = vcmp.eq.s32.totalorder %v931_v61, 1 }
 0x15f   : > { %v1910_v5 = vmul.f32 -1.442695, %v897_v31  ;;  %v898_v60 = vadd.f32 %v823_v63, %v688_v3  ;;  %v900_v13 = vadd.f32 %v894_v2, %v690_v56 }
 0x161   : > { %2031 = vpow2.f32 %v1910_v5  ;;  %v1911_v62 = vmul.f32 -1.442695, %v898_v60  ;;  %v1912_v57 = vmul.f32 -1.442695, %v900_v13 }
 0x163   : > { %2033 = vpow2.f32 %v1911_v62 }
 0x164   : > { %2035 = vpow2.f32 %v1912_v57 }
 0x16e   : > { %v2032_v54 = vpop.eup %2031 }
 0x16f   : > { %v904_v22 = vadd.f32 1.0, %v2032_v54 }
 0x170   : > { %v2034_v59 = vpop.eup %2033 }
 0x171   : > { %2037 = vrcp.f32 %v904_v22  ;;  %v910_v1 = vadd.f32 1.0, %v2034_v59  ;;  %v2036_v55 = vpop.eup %2035 }
 0x172   : > { %2039 = vtanh.f32 %v899_v6  ;;  %v917_v3 = vadd.f32 1.0, %v2036_v55  ;;  %v1189_v55 = vpop.permute.xlu0 %1188 }
 0x173   : > { %2041 = vrcp.f32 %v910_v1  ;;  %vm1190_vm5 = vcmp.eq.s32.totalorder %v1189_v55, 1  ;;  %v1473_v55 = vld [vmem:[%s2540_s2 + $0x40] sm:$0xff] }
 0x174   : > { %2043 = vrcp.f32 %v917_v3 }
 0x17e   : > { %v2038_v0 = vpop.eup %2037 }
 0x17f   : > { %v2040_v4 = vpop.eup %2039 }
 0x180   : > { %v2042_v31 = vpop.eup %2041  ;;  %v921_v5 = vmul.f32 %v2040_v4, %v2038_v0 }
 0x181   : > { %v920_v63 = vmul.f32 0.0, %v2042_v31  ;;  %v2044_v62 = vpop.eup %2043 }
 0x183   : > { %v922_v60 = vadd.f32 %v921_v5, %v920_v63 }
 0x185   : > { %2045 = vtanh.f32 %v922_v60  ;;  %v2904_v58 = vsel %vm932_vm2, %v922_v60, 0.0 }
 0x192   : > { %v2046_v2 = vpop.eup %2045 }
 0x193   : > { %v924_v56 = vmul.f32 %v2046_v2, %v2044_v62  ;;  %v1528_v2 = vld [vmem:[%s2540_s2 + $0x1f8] sm:$0xff] }
 0x195   : > { %v2912_v13 = vsel %vm932_vm2, %v924_v56, 0.0  ;;  %1941 = vmatmul.mubr.msk.f32.vlgmr.msra.gmra.mxu0 %vm932_vm2, %v924_v56  ;;  %1942 = vmatmul.mubr.msk.f32.vlgmr.msra.gmra.mxu1 %vm932_vm2, %v924_v56  ;;  %v1525_v56 = vld [vmem:[%s2540_s2 + $0x1e0] sm:$0xff] }
 0x196   : > { %935 = vst [vmem:[%s934_s27] sm:$0xff] %v2912_v13  ;;  %1272 = vmatpush1.msra.mxu0 %v2549_v7  ;;  %1343 = vmatpush1.msra.mxu1 %v2552_v8  ;;  %v3232_v7 = vld [vmem:[#allocation17_spill] sm:$0xff]  ;;  %v3233_v8 = vld [vmem:[#allocation18_spill] sm:$0xff]  ;;  %s1460_s27 = scalar_lea.vmem [#allocation4], %s1940_s14 }
 0x197   : > { %1273 = vmatprep.subr.mxu0 %v2556_v9  ;;  %1344 = vmatprep.subr.mxu1 %v2559_v10  ;;  %v3234_v9 = vld [vmem:[#allocation19_spill] sm:$0xff]  ;;  %v3235_v10 = vld [vmem:[#allocation20_spill] sm:$0xff] }
 0x198   : > { %1274 = vmatpush1.msra.mxu0 %v2563_v11  ;;  %1345 = vmatpush1.msra.mxu1 %v2568_v12  ;;  %v3236_v11 = vld [vmem:[#allocation21_spill] sm:$0xff]  ;;  %v3237_v12 = vld [vmem:[#allocation22_spill] sm:$0xff] }
 0x199   : > { %1275 = vmatprep.subr.mxu0 %v2573_v14  ;;  %1346 = vmatprep.subr.mxu1 %v2576_v15  ;;  %v3238_v14 = vld [vmem:[#allocation23_spill] sm:$0xff]  ;;  %v3239_v15 = vld [vmem:[#allocation24_spill] sm:$0xff] }
 0x19a   : > { %1276 = vmatpush1.msra.mxu0 %v2581_v16  ;;  %1347 = vmatpush1.msra.mxu1 %v2584_v17  ;;  %v3240_v16 = vld [vmem:[#allocation25_spill] sm:$0xff]  ;;  %v3241_v17 = vld [vmem:[#allocation26_spill] sm:$0xff] }
 0x19b   : > { %1277 = vmatprep.subr.mxu0 %v2588_v18  ;;  %1348 = vmatprep.subr.mxu1 %v2591_v19  ;;  %v3242_v18 = vld [vmem:[#allocation27_spill] sm:$0xff]  ;;  %v3243_v19 = vld [vmem:[#allocation28_spill] sm:$0xff] }
 0x19c   : > { %1278 = vmatpush1.msra.mxu0 %v2596_v20  ;;  %1349 = vmatpush1.msra.mxu1 %v2601_v21  ;;  %v3244_v20 = vld [vmem:[#allocation29_spill] sm:$0xff]  ;;  %v3245_v21 = vld [vmem:[#allocation31_spill] sm:$0xff] }
 0x19d   : > { %1279 = vmatprep.subr.mxu0 %v2606_v23  ;;  %1350 = vmatprep.subr.mxu1 %v2611_v24  ;;  %v3246_v23 = vld [vmem:[#allocation32_spill] sm:$0xff]  ;;  %v3247_v24 = vld [vmem:[#allocation33_spill] sm:$0xff] }
 0x19e   : > { %1280 = vmatpush1.msra.mxu0 %v2615_v25  ;;  %1351 = vmatpush1.msra.mxu1 %v2618_v26  ;;  %v3248_v25 = vld [vmem:[#allocation34_spill] sm:$0xff]  ;;  %v3249_v26 = vld [vmem:[#allocation35_spill] sm:$0xff] }
 0x19f   : > { %1281 = vmatprep.subr.mxu0 %v2623_v27  ;;  %1352 = vmatprep.subr.mxu1 %v2626_v28  ;;  %v3250_v27 = vmov 0.0   ;;  %v3251_v28 = vld [vmem:[#allocation36_spill] sm:$0xff] }
 0x1a0   : > { %1282 = vmatpush1.msra.mxu0 %v2630_v29  ;;  %1353 = vmatpush1.msra.mxu1 %v2635_v30  ;;  %v1442_v29 = vstv %s2985_s30  ;;  %v1700_v30 = vstv %s2981_s24  ;;  %s1932_s30 = sshll.u32 %s2253_s21, 7  ;;  %s1715_s21 = scalar_lea.sflag [#allocation7], %s2459_s25 }
 0x1a1   : > { %1283 = vmatprep.subr.mxu0 %v2640_v32  ;;  %1354 = vmatprep.subr.mxu1 %v2645_v33  ;;  %v3252_v32 = vld [vmem:[#allocation30_spill] sm:$0xff]  ;;  %v3253_v33 = vmov 0  }
 0x1a2   : > { %1284 = vmatpush1.msra.mxu0 %v2649_v34  ;;  %1355 = vmatpush1.msra.mxu1 %v2652_v35  ;;  %vm1443_vm3 = vcmp.lt.s32.totalorder %v1442_v29, %v3252_v32  ;;  %vm1701_vm4 = vcmp.lt.s32.totalorder %v1700_v30, %v3252_v32  ;;  %v1502_v29 = vld [vmem:[%s2540_s2 + $0x128] sm:$0xff]  ;;  %v1504_v30 = vld [vmem:[%s2540_s2 + $0x138] sm:$0xff]  ;;  %v1501_v32 = vld [vmem:[%s2540_s2 + $0x120] sm:$0xff] }
 0x1a3   : > { %1285 = vmatprep.subr.mxu0 %v2657_v36  ;;  %1356 = vmatprep.subr.mxu1 %v2660_v37  ;;  %v1444_v34 = vsel %vm1443_vm3, 1, %v3253_v33  ;;  %v1702_v35 = vsel %vm1701_vm4, 1, %v3253_v33  ;;  %v945_v36 = vld [vmem:[%s944_s16] sm:$0xff]  ;;  %v1503_v33 = vld [vmem:[%s2540_s2 + $0x130] sm:$0xff] }
 0x1a4   : > { %1286 = vmatpush1.msra.mxu0 %v2664_v38  ;;  %1357 = vmatpush1.msra.mxu1 %v2667_v39  ;;  %v946_v39 = vld [vmem:[%s944_s16 + $0x8] sm:$0xff] }
 0x1a5   : > { %1287 = vmatprep.subr.mxu0 %v2672_v40  ;;  %1358 = vmatprep.subr.mxu1 %v2677_v41 }
 0x1a6   : > { %1288 = vmatpush1.msra.mxu0 %v2682_v42  ;;  %1359 = vmatpush1.msra.mxu1 %v2685_v43 }
 0x1a7   : > { %1289 = vmatprep.subr.mxu0 %v2690_v44  ;;  %1360 = vmatprep.subr.mxu1 %v2693_v45 }
 0x1a8   : > { %1290 = vmatpush1.msra.mxu0 %v2697_v46  ;;  %1361 = vmatpush1.msra.mxu1 %v2700_v47  ;;  %v948_v46 = vld [vmem:[%s944_s16 + $0x18] sm:$0xff] }
 0x1a9   : > { %1291 = vmatprep.subr.mxu0 %v2705_v48  ;;  %1362 = vmatprep.subr.mxu1 %v2708_v49  ;;  %v947_v49 = vld [vmem:[%s944_s16 + $0x10] sm:$0xff] }
 0x1aa   : > { %1292 = vmatpush1.msra.mxu0 %v2714_v50  ;;  %1363 = vmatpush1.msra.mxu1 %v2717_v51 }
 0x1ab   : > { %1293 = vmatprep.subr.mxu0 %v2722_v52  ;;  %1364 = vmatprep.subr.mxu1 %v3232_v7  ;;  %v1522_v7 = vld [vmem:[%s2540_s2 + $0x1c8] sm:$0xff] }
 0x1ac   : > { %1294 = vmatpush1.msra.mxu0 %v3233_v8  ;;  %1365 = vmatpush1.msra.mxu1 %v3234_v9  ;;  %v1524_v8 = vld [vmem:[%s2540_s2 + $0x1d8] sm:$0xff]  ;;  %v1521_v9 = vld [vmem:[%s2540_s2 + $0x1c0] sm:$0xff] }
 0x1ad   : > { %1295 = vmatprep.subr.mxu0 %v3235_v10  ;;  %1366 = vmatprep.subr.mxu1 %v3236_v11  ;;  %v1523_v10 = vld [vmem:[%s2540_s2 + $0x1d0] sm:$0xff]  ;;  %v1518_v11 = vld [vmem:[%s2540_s2 + $0x1a8] sm:$0xff] }
 0x1ae   : > { %1296 = vmatpush1.msra.mxu0 %v3237_v12  ;;  %1367 = vmatpush1.msra.mxu1 %v3238_v14  ;;  %v1520_v12 = vld [vmem:[%s2540_s2 + $0x1b8] sm:$0xff]  ;;  %v1517_v14 = vld [vmem:[%s2540_s2 + $0x1a0] sm:$0xff] }
 0x1af   : > { %1297 = vmatprep.subr.mxu0 %v3239_v15  ;;  %1368 = vmatprep.subr.mxu1 %v3240_v16  ;;  %v1519_v15 = vld [vmem:[%s2540_s2 + $0x1b0] sm:$0xff]  ;;  %v1514_v16 = vld [vmem:[%s2540_s2 + $0x188] sm:$0xff] }
 0x1b0   : > { %1298 = vmatpush1.msra.mxu0 %v3241_v17  ;;  %1369 = vmatpush1.msra.mxu1 %v3242_v18  ;;  %v1516_v17 = vld [vmem:[%s2540_s2 + $0x198] sm:$0xff]  ;;  %v1513_v18 = vld [vmem:[%s2540_s2 + $0x180] sm:$0xff] }
 0x1b1   : > { %1299 = vmatprep.subr.mxu0 %v3243_v19  ;;  %1370 = vmatprep.subr.mxu1 %v3244_v20  ;;  %v1515_v19 = vld [vmem:[%s2540_s2 + $0x190] sm:$0xff]  ;;  %v1510_v20 = vld [vmem:[%s2540_s2 + $0x168] sm:$0xff] }
 0x1b2   : > { %1300 = vmatpush1.msra.mxu0 %v3245_v21  ;;  %1371 = vmatpush1.msra.mxu1 %v3246_v23  ;;  %v1512_v21 = vld [vmem:[%s2540_s2 + $0x178] sm:$0xff]  ;;  %v1509_v23 = vld [vmem:[%s2540_s2 + $0x160] sm:$0xff] }
 0x1b3   : > { %1301 = vmatprep.subr.mxu0 %v3247_v24  ;;  %1372 = vmatprep.subr.mxu1 %v3248_v25  ;;  %v1511_v24 = vld [vmem:[%s2540_s2 + $0x170] sm:$0xff]  ;;  %v1506_v25 = vld [vmem:[%s2540_s2 + $0x148] sm:$0xff] }
 0x1b4   : > { %1302 = vmatpush1.msra.mxu0 %v3249_v26  ;;  %1335 = vmatprep.mubr.f32.mxu0 %v3250_v27  ;;  %v1508_v26 = vld [vmem:[%s2540_s2 + $0x158] sm:$0xff] }
 0x1b5   : > { %1373 = vmatpush1.msra.mxu1 %v3251_v28  ;;  %1406 = vmatprep.mubr.f32.mxu1 %v3250_v27  ;;  %v1507_v28 = vld [vmem:[%s2540_s2 + $0x150] sm:$0xff] }
 0x1b6   : > { %1446 = vperm.xlu1 %2030, %v1444_v34   ;;  %1600 = vmatprep.subr.mxu1 %v1528_v2  ;;  %v1498_v34 = vld [vmem:[%s2540_s2 + $0x108] sm:$0xff]  ;;  %v1467_v2 = vld [vmem:[%s2540_s2 + $0x10] sm:$0xff] }
 0x1ba   : > { %1704 = vperm.xlu1 %2030, %v1702_v35   ;;  %v1500_v35 = vld [vmem:[%s2540_s2 + $0x118] sm:$0xff] }
 0x255   : > { %v1079_v37 = vpop.f32.mrf.mxu0  ;;  %v1150_v43 = vpop.f32.mrf.mxu1 }
 0x256   : > { %v1155_v38 = vadd.f32 %v1079_v37, %v945_v36  ;;  %v1157_v51 = vadd.f32 %v1150_v43, %v947_v49  ;;  %v1497_v36 = vld [vmem:[%s2540_s2 + $0x100] sm:$0xff]  ;;  %v1499_v37 = vld [vmem:[%s2540_s2 + $0x110] sm:$0xff]  ;;  %v1492_v43 = vld [vmem:[%s2540_s2 + $0xd8] sm:$0xff] }
 0x257   : > { %v1081_v40 = vpop.f32.mrf.mxu0  ;;  %v1152_v45 = vpop.f32.mrf.mxu1  ;;  %v1487_v49 = vld [vmem:[%s2540_s2 + $0xb0] sm:$0xff] }
 0x258   : > { %v1916_v41 = vmul.f32 -1.442695, %v1155_v38  ;;  %v1156_v42 = vadd.f32 %v1081_v40, %v946_v39  ;;  %v1158_v47 = vadd.f32 %v1152_v45, %v948_v46  ;;  %v1494_v38 = vld [vmem:[%s2540_s2 + $0xe8] sm:$0xff]  ;;  %v1496_v39 = vld [vmem:[%s2540_s2 + $0xf8] sm:$0xff]  ;;  %v1493_v40 = vld [vmem:[%s2540_s2 + $0xe0] sm:$0xff] }
 0x259   : > { %v1491_v45 = vld [vmem:[%s2540_s2 + $0xd0] sm:$0xff]  ;;  %v1486_v46 = vld [vmem:[%s2540_s2 + $0xa8] sm:$0xff] }
 0x25a   : > { %2047 = vpow2.f32 %v1916_v41  ;;  %v1917_v44 = vmul.f32 -1.442695, %v1156_v42  ;;  %v1918_v48 = vmul.f32 -1.442695, %v1158_v47  ;;  %v1495_v41 = vld [vmem:[%s2540_s2 + $0xf0] sm:$0xff]  ;;  %v1490_v42 = vld [vmem:[%s2540_s2 + $0xc8] sm:$0xff] }
 0x25b   : > { %v1488_v47 = vld [vmem:[%s2540_s2 + $0xb8] sm:$0xff] }
 0x25c   : > { %2049 = vpow2.f32 %v1917_v44  ;;  %v1489_v44 = vld [vmem:[%s2540_s2 + $0xc0] sm:$0xff] }
 0x25d   : > { %2051 = vpow2.f32 %v1918_v48  ;;  %v1485_v48 = vld [vmem:[%s2540_s2 + $0xa0] sm:$0xff] }
 0x267   : > { %v2048_v50 = vpop.eup %2047 }
 0x268   : > { %v1162_v52 = vadd.f32 1.0, %v2048_v50  ;;  %v1482_v50 = vld [vmem:[%s2540_s2 + $0x88] sm:$0xff] }
 0x269   : > { %v2050_v57 = vpop.eup %2049 }
 0x26a   : > { %2053 = vrcp.f32 %v1162_v52  ;;  %v1168_v53 = vadd.f32 1.0, %v2050_v57  ;;  %v2052_v54 = vpop.eup %2051  ;;  %v1481_v52 = vld [vmem:[%s2540_s2 + $0x80] sm:$0xff]  ;;  %v1483_v57 = vld [vmem:[%s2540_s2 + $0x90] sm:$0xff] }
 0x26b   : > { %2055 = vtanh.f32 %v1157_v51  ;;  %v1175_v1 = vadd.f32 1.0, %v2052_v54  ;;  %v1484_v51 = vld [vmem:[%s2540_s2 + $0x98] sm:$0xff] }
 0x26c   : > { %2057 = vrcp.f32 %v1168_v53  ;;  %v1478_v53 = vld [vmem:[%s2540_s2 + $0x68] sm:$0xff]  ;;  %v1480_v54 = vld [vmem:[%s2540_s2 + $0x78] sm:$0xff] }
 0x26d   : > { %2059 = vrcp.f32 %v1175_v1  ;;  %v1476_v1 = vld [vmem:[%s2540_s2 + $0x58] sm:$0xff] }
 0x277   : > { %v2054_v6 = vpop.eup %2053 }
 0x278   : > { %v2056_v22 = vpop.eup %2055 }
 0x279   : > { %v2058_v59 = vpop.eup %2057  ;;  %v1179_v0 = vmul.f32 %v2056_v22, %v2054_v6  ;;  %v1477_v6 = vld [vmem:[%s2540_s2 + $0x60] sm:$0xff]  ;;  %v1479_v22 = vld [vmem:[%s2540_s2 + $0x70] sm:$0xff] }
 0x27a   : > { %v1178_v4 = vmul.f32 %v2058_v59, %v2904_v58  ;;  %v2060_v3 = vpop.eup %2059  ;;  %v1474_v59 = vld [vmem:[%s2540_s2 + $0x48] sm:$0xff] }
 0x27c   : > { %v1180_v61 = vadd.f32 %v1179_v0, %v1178_v4  ;;  %v1475_v0 = vld [vmem:[%s2540_s2 + $0x50] sm:$0xff]  ;;  %v1470_v4 = vld [vmem:[%s2540_s2 + $0x28] sm:$0xff] }
 0x27e   : > { %2061 = vtanh.f32 %v1180_v61  ;;  %v2998_v31 = vsel %vm1190_vm5, %v1180_v61, %v2904_v58  ;;  %v1526_v58 = vld [vmem:[%s2540_s2 + $0x1e8] sm:$0xff]  ;;  %v1472_v61 = vld [vmem:[%s2540_s2 + $0x38] sm:$0xff] }
 0x27f   : > { %1529 = vmatprep.subr.mxu0 %v1526_v58  ;;  %v1465_v58 = vld [vmem:[%s2540_s2] sm:$0xff] }
 0x28b   : > { %v2062_v63 = vpop.eup %2061 }
 0x28c   : > { %v1182_v5 = vmul.f32 %v2062_v63, %v2060_v3  ;;  %v1469_v3 = vld [vmem:[%s2540_s2 + $0x20] sm:$0xff]  ;;  %v1471_v63 = vld [vmem:[%s2540_s2 + $0x30] sm:$0xff] }
 0x28e   : > { %v1191_v60 = vsel %vm1190_vm5, %v1182_v5, 0.0  ;;  %v3004_v62 = vsel %vm1190_vm5, %v1182_v5, %v2912_v13  ;;  %v1527_v13 = vld [vmem:[%s2540_s2 + $0x1f0] sm:$0xff]  ;;  %v1466_v5 = vld [vmem:[%s2540_s2 + $0x8] sm:$0xff] }
 0x28f   : > { %1336 = vmatmul.mubr.f32.vlgmr.msra.gmra.mxu0 %v3004_v62  ;;  %1193 = vst [vmem:[%s1192_s10] sm:$0xff] %v1191_v60  ;;  %1407 = vmatmul.mubr.f32.vlgmr.msra.gmra.mxu1 %v3004_v62  ;;  %v1468_v60 = vld [vmem:[%s2540_s2 + $0x18] sm:$0xff]  ;;  %s3094_s10 = scalar_lea.hbm %s3149_s5, %s1932_s30 }
 0x290   : > { %1593 = vmatprep.mubr.f32.mxu0 %v3250_v27  ;;  %1664 = vmatprep.mubr.f32.mxu1 %v3250_v27  ;;  %v1505_v27 = vld [vmem:[%s2540_s2 + $0x140] sm:$0xff]  ;;  %s1450_s2 = scalar_lea.vmem %s2907_s26, %s1919_s29 [#allocation11]  ;;  %s2177_s29 = scalar_lea.vmem %s3096_s9, 512 }
 0x291   : > { %1530 = vmatpush1.msra.mxu0 %v1525_v56  ;;  %1601 = vmatpush1.msra.mxu1 %v1527_v13  ;;  %v1203_v56 = vld [vmem:[%s1202_s12] sm:$0xff]  ;;  %p2178_p3 = scmp.ne.s32.totalorder %s3096_s9, %s2177_s29  ;;  %s2272_s26 = smov [#allocation11]  }
 0x292   : > { %1531 = vmatprep.subr.mxu0 %v1522_v7  ;;  %1602 = vmatprep.subr.mxu1 %v1524_v8  ;;  %v1204_v8 = vld [vmem:[%s1202_s12 + $0x8] sm:$0xff]  ;;  %s2181_s24 = sshll.u32 %s2272_s26, 4  ;;  %s2182_s24 = int_to_ptr.vmem [resolvable:$false] %s2181_s24 }
 0x293   : > { %1532 = vmatpush1.msra.mxu0 %v1521_v9  ;;  %1603 = vmatpush1.msra.mxu1 %v1523_v10  ;;  %p2179_p2 = pnand %p2178_p3, %p3254_p12  ;;  %s2183_s13 = scalar_lea.vmem %s2182_s24, 1024 }
 0x294   : > { %1533 = vmatprep.subr.mxu0 %v1518_v11  ;;  %1604 = vmatprep.subr.mxu1 %v1520_v12  ;;  %p2184_p7 = scmp.lt.s32.totalorder %s3096_s9, %s2182_s24  ;;  %p2185_p4 = scmp.lt.s32.totalorder %s2183_s13, %s2177_s29 }
 0x295   : > { %1534 = vmatpush1.msra.mxu0 %v1517_v14  ;;  %1605 = vmatpush1.msra.mxu1 %v1519_v15  ;;  %p2180_p13 = pneg %p2179_p2 }
 0x296   : > { %1535 = vmatprep.subr.mxu0 %v1514_v16  ;;  %1606 = vmatprep.subr.mxu1 %v1516_v17  ;;  %v1206_v16 = vld [vmem:[%s1202_s12 + $0x18] sm:$0xff]  ;;  %p2186_p9 = por %p2185_p4, %p2184_p7 }
 0x297   : > { %1536 = vmatpush1.msra.mxu0 %v1513_v18  ;;  %1607 = vmatpush1.msra.mxu1 %v1515_v19  ;;  %v1205_v19 = vld [vmem:[%s1202_s12 + $0x10] sm:$0xff] }
 0x298   : > { %1537 = vmatprep.subr.mxu0 %v1510_v20  ;;  %1608 = vmatprep.subr.mxu1 %v1512_v21  ;;  %p2187_p11 = pnand %p2186_p9, %p2180_p13 }
 0x299   : > { %1538 = vmatpush1.msra.mxu0 %v1509_v23  ;;  %1609 = vmatpush1.msra.mxu1 %v1511_v24 }
 0x29a   : > { %1539 = vmatprep.subr.mxu0 %v1506_v25  ;;  %1610 = vmatprep.subr.mxu1 %v1508_v26 }
 0x29b   : > { %1540 = vmatpush1.msra.mxu0 %v1505_v27  ;;  %1611 = vmatpush1.msra.mxu1 %v1507_v28 }
 0x29c   : > { %1541 = vmatprep.subr.mxu0 %v1502_v29  ;;  %1612 = vmatprep.subr.mxu1 %v1504_v30  ;;  %v1447_v29 = vpop.permute.xlu1 %1446 }
 0x29d   : > { %1542 = vmatpush1.msra.mxu0 %v1501_v32  ;;  %1613 = vmatpush1.msra.mxu1 %v1503_v33  ;;  %vm1448_vm6 = vcmp.eq.s32.totalorder %v1447_v29, 1 }
 0x29e   : > { %1543 = vmatprep.subr.mxu0 %v1498_v34  ;;  %1614 = vmatprep.subr.mxu1 %v1500_v35 }
 0x29f   : > { %1544 = vmatpush1.msra.mxu0 %v1497_v36  ;;  %1615 = vmatpush1.msra.mxu1 %v1499_v37 }
 0x2a0   : > { %1545 = vmatprep.subr.mxu0 %v1494_v38  ;;  %1616 = vmatprep.subr.mxu1 %v1496_v39 }
 0x2a1   : > { %1546 = vmatpush1.msra.mxu0 %v1493_v40  ;;  %1617 = vmatpush1.msra.mxu1 %v1495_v41 }
 0x2a2   : > { %1547 = vmatprep.subr.mxu0 %v1490_v42  ;;  %1618 = vmatprep.subr.mxu1 %v1492_v43  ;;  %v1461_v42 = vld [vmem:[%s1460_s27] sm:$0xff] }
 0x2a3   : > { %1548 = vmatpush1.msra.mxu0 %v1489_v44  ;;  %1619 = vmatpush1.msra.mxu1 %v1491_v45 }
 0x2a4   : > { %1549 = vmatprep.subr.mxu0 %v1486_v46  ;;  %1620 = vmatprep.subr.mxu1 %v1488_v47 }
 0x2a5   : > { %1550 = vmatpush1.msra.mxu0 %v1485_v48  ;;  %1621 = vmatpush1.msra.mxu1 %v1487_v49 }
 0x2a6   : > { %1551 = vmatprep.subr.mxu0 %v1482_v50  ;;  %1622 = vmatprep.subr.mxu1 %v1484_v51  ;;  %v1464_v50 = vld [vmem:[%s1460_s27 + $0x18] sm:$0xff] }
 0x2a7   : > { %1552 = vmatpush1.msra.mxu0 %v1481_v52  ;;  %1623 = vmatpush1.msra.mxu1 %v1483_v57  ;;  %v1463_v57 = vld [vmem:[%s1460_s27 + $0x10] sm:$0xff] }
 0x2a8   : > { %1553 = vmatprep.subr.mxu0 %v1478_v53  ;;  %1624 = vmatprep.subr.mxu1 %v1480_v54 }
 0x2a9   : > { %1554 = vmatpush1.msra.mxu0 %v1477_v6  ;;  %1625 = vmatpush1.msra.mxu1 %v1479_v22 }
 0x2aa   : > { %1555 = vmatprep.subr.mxu0 %v1474_v59  ;;  %1626 = vmatprep.subr.mxu1 %v1476_v1 }
 0x2ab   : > { %1556 = vmatpush1.msra.mxu0 %v1473_v55  ;;  %1627 = vmatpush1.msra.mxu1 %v1475_v0 }
 0x2ac   : > { %1557 = vmatprep.subr.mxu0 %v1470_v4  ;;  %1628 = vmatprep.subr.mxu1 %v1472_v61 }
 0x2ad   : > { %1558 = vmatpush1.msra.mxu0 %v1469_v3  ;;  %1629 = vmatpush1.msra.mxu1 %v1471_v63 }
 0x2ae   : > { %1559 = vmatprep.subr.mxu0 %v1466_v5  ;;  %1630 = vmatprep.subr.mxu1 %v1468_v60 }
 0x2af   : > { %1560 = vmatpush1.msra.mxu0 %v1465_v58  ;;  %1631 = vmatpush1.msra.mxu1 %v1467_v2  ;;  %v1705_v58 = vpop.permute.xlu1 %1704 }
 0x2b0   : > { %vm1706_vm7 = vcmp.eq.s32.totalorder %v1705_v58, 1 }
 0x34f   : > { %v1337_v13 = vpop.f32.mrf.mxu0  ;;  %v1408_v12 = vpop.f32.mrf.mxu1 }
 0x350   : > { %v1413_v7 = vadd.f32 %v1337_v13, %v1203_v56  ;;  %v1415_v21 = vadd.f32 %v1408_v12, %v1205_v19 }
 0x351   : > { %v1339_v9 = vpop.f32.mrf.mxu0  ;;  %v1410_v15 = vpop.f32.mrf.mxu1 }
 0x352   : > { %v1922_v10 = vmul.f32 -1.442695, %v1413_v7  ;;  %v1414_v11 = vadd.f32 %v1339_v9, %v1204_v8  ;;  %v1416_v17 = vadd.f32 %v1410_v15, %v1206_v16 }
 0x354   : > { %2063 = vpow2.f32 %v1922_v10  ;;  %v1923_v14 = vmul.f32 -1.442695, %v1414_v11  ;;  %v1924_v18 = vmul.f32 -1.442695, %v1416_v17 }
 0x356   : > { %2065 = vpow2.f32 %v1923_v14 }
 0x357   : > { %2067 = vpow2.f32 %v1924_v18 }
 0x361   : > { %v2064_v20 = vpop.eup %2063 }
 0x362   : > { %v1420_v23 = vadd.f32 1.0, %v2064_v20 }
 0x363   : > { %v2066_v24 = vpop.eup %2065 }
 0x364   : > { %2069 = vrcp.f32 %v1420_v23  ;;  %v1426_v25 = vadd.f32 1.0, %v2066_v24  ;;  %v2068_v26 = vpop.eup %2067 }
 0x365   : > { %2071 = vtanh.f32 %v1415_v21  ;;  %v1433_v32 = vadd.f32 1.0, %v2068_v26 }
 0x366   : > { %2073 = vrcp.f32 %v1426_v25 }
 0x367   : > { %2075 = vrcp.f32 %v1433_v32 }
 0x371   : > { %v2070_v27 = vpop.eup %2069 }
 0x372   : > { %v2072_v28 = vpop.eup %2071 }
 0x373   : > { %v2074_v30 = vpop.eup %2073  ;;  %v1437_v34 = vmul.f32 %v2072_v28, %v2070_v27 }
 0x374   : > { %v1436_v33 = vmul.f32 %v2074_v30, %v2998_v31  ;;  %v2076_v37 = vpop.eup %2075 }
 0x376   : > { %v1438_v35 = vadd.f32 %v1437_v34, %v1436_v33 }
 0x378   : > { %2077 = vtanh.f32 %v1438_v35  ;;  %v1453_v36 = vsel %vm1448_vm6, %v1438_v35, %v2998_v31  ;;  %v1462_v31 = vld [vmem:[%s1460_s27 + $0x8] sm:$0xff] }
 0x385   : > { %v2078_v38 = vpop.eup %2077 }
 0x386   : > { %v1440_v39 = vmul.f32 %v2078_v38, %v2076_v37 }
 0x388   : > { %v1449_v40 = vsel %vm1448_vm6, %v1440_v39, 0.0  ;;  %v1452_v41 = vsel %vm1448_vm6, %v1440_v39, %v3004_v62 }
 0x389   : > { %1451 = vst [vmem:[%s1450_s2] sm:$0xff] %v1449_v40  ;;  %1594 = vmatmul.mubr.f32.vlgmr.msra.gmra.mxu0 %v1452_v41  ;;  %1665 = vmatmul.mubr.f32.vlgmr.msra.gmra.mxu1 %v1452_v41 }
 0x449   : > { %v1595_v43 = vpop.f32.mrf.mxu0  ;;  %v1666_v48 = vpop.f32.mrf.mxu1 }
 0x44a   : > { %v1671_v44 = vadd.f32 %v1595_v43, %v1461_v42  ;;  %v1673_v54 = vadd.f32 %v1666_v48, %v1463_v57 }
 0x44b   : > { %v1597_v45 = vpop.f32.mrf.mxu0  ;;  %v1668_v62 = vpop.f32.mrf.mxu1 }
 0x44c   : > { %v1928_v46 = vmul.f32 -1.442695, %v1671_v44  ;;  %v1672_v47 = vadd.f32 %v1597_v45, %v1462_v31  ;;  %v1674_v51 = vadd.f32 %v1668_v62, %v1464_v50 }
 0x44e   : > { %2079 = vpow2.f32 %v1928_v46  ;;  %v1929_v49 = vmul.f32 -1.442695, %v1672_v47  ;;  %v1930_v52 = vmul.f32 -1.442695, %v1674_v51 }
 0x450   : > { %2081 = vpow2.f32 %v1929_v49 }
 0x451   : > { %2083 = vpow2.f32 %v1930_v52 }
 0x45b   : > { %v2080_v53 = vpop.eup %2079 }
 0x45c   : > { %v1678_v6 = vadd.f32 1.0, %v2080_v53 }
 0x45d   : > { %v2082_v22 = vpop.eup %2081 }
 0x45e   : > { %2085 = vrcp.f32 %v1678_v6  ;;  %v1684_v59 = vadd.f32 1.0, %v2082_v22  ;;  %v2084_v1 = vpop.eup %2083 }
 0x45f   : > { %2087 = vtanh.f32 %v1673_v54  ;;  %v1691_v61 = vadd.f32 1.0, %v2084_v1 }
 0x460   : > { %2089 = vrcp.f32 %v1684_v59 }
 0x461   : > { %2091 = vrcp.f32 %v1691_v61 }
 0x46b   : > { %v2086_v55 = vpop.eup %2085 }
 0x46c   : > { %v2088_v0 = vpop.eup %2087 }
 0x46d   : > { %v2090_v4 = vpop.eup %2089  ;;  %v1695_v3 = vmul.f32 %v2088_v0, %v2086_v55 }
 0x46e   : > { %v1694_v63 = vmul.f32 %v2090_v4, %v1453_v36  ;;  %v2092_v60 = vpop.eup %2091 }
 0x470   : > { %v1696_v5 = vadd.f32 %v1695_v3, %v1694_v63 }
 0x472   : > { %2093 = vtanh.f32 %v1696_v5 }
 0x47f   : > { %v2094_v2 = vpop.eup %2093 }
 0x480   : > { %v1698_v56 = vmul.f32 %v2094_v2, %v2092_v60 }
 0x482   : > { %v1707_v13 = vsel %vm1706_vm7, %v1698_v56, 0.0 }
 0x483   : > { %1709 = vst [vmem:[%s1708_s28] sm:$0xff] %v1707_v13 }
 0x484   : > { %2190 = shalt.err (!%p2187_p11)
}
 0x485   : > { %s2191_s11 = scalar_lea.hbm %s3094_s10, 512  ;;  %s2195_s15 = scalar_lea.hbm %s3149_s5, 1024 }
 0x486   : > { %p2192_p1 = scmp.ne.s32.totalorder %s3094_s10, %s2191_s11  ;;  %p2196_p5 = scmp.lt.s32.totalorder %s3094_s10, %s3149_s5 }
 0x487   : > { %p2197_p8 = scmp.lt.s32.totalorder %s2195_s15, %s2191_s11 }
 0x488   : > { %p2193_p10 = pnand %p2192_p1, %p3254_p12 }
 0x489   : > { %p2198_p0 = por %p2197_p8, %p2196_p5 }
 0x48a   : > { %p2194_p6 = pneg %p2193_p10 }
 0x48c   : > { %p2199_p3 = pnand %p2198_p0, %p2194_p6 }
 0x48e   : > { %2202 = shalt.err (!%p2199_p3)
}
 0x48f   : > { %s2273_s27 = smov 128   ;;  %s2274_s30 = smov 256  }
 0x490   : > { %s2275_s28 = smov 8  }
 0x491   : > { %1951 = dma.vmem_to_hbm [thread:$0]  (%p3254_p12), %s3096_s9, 512, %s3094_s10, %s1715_s21, %s2273_s27, %s2274_s30, %s2275_s28  }
 0x492 PF: > { %s1749_s17 = sand.u32 1, %s2241_s18   ;;  %p3255_p2 = scmp.ne.s32.totalorder %s3195_s8, 0 }
 0x493   : > { %p3256_p13 = scmp.ge.s32.totalorder %s2261_s23, 2  ;;  %s1750_s16 = scalar_lea.sflag [#allocation7], %s1749_s17 }
 0x495   : > { %p1964_p7 = pnand %p3256_p13, %p3255_p2 }
 0x497   : > { %p1965_p4 = pneg %p1964_p7 }
 0x499   : > { %2236 = dma.done.wait (%p1965_p4), %s1750_s16, 512  }
 0x49a   : > { %2238 = vsyncadd (%p1965_p4), %s1750_s16, 4294966784  ;;  %s24_s23 = sadd.s32 1, %s2261_s23   ;;  %s3257_s21 = sld [smem:[#allocation15_spill]] }
 0x49b   : > { %p21_p9 = scmp.ge.s32.totalorder %s24_s23, 4   ;;  %s3258_s22 = sld [smem:[#allocation16_spill]] }
 0x49c   : > { %s3259_s18 = smov %s2245_s19  ;;  %s3260_s19 = smov %s2249_s20 }
 0x49d   : > { %s3261_s20 = smov %s2370_s7  ;;  %23 = sbr.rel (!%p21_p9) target bundleno = 10 (0xa), region = 124 }
 0x4a2   :  { %1755 = vsyncpa [#allocation6], 1 }
 0x4a3   :  { %1757 = vsyncpa [#allocation6 + $0x1], 1 }
 0x4a4   :  { %1758 = vsyncpa [#allocation9], 1 }
 0x4a5   :  { %1760 = vsyncpa [#allocation9 + $0x1], 1 }
 0x4a6   :  { %1761 = vsyncpa [#allocation7], 1 }
 0x4a7   :  { %1763 = vsyncpa [#allocation7 + $0x1], 1 }

</bundles_post_ra>
